<compile_context>
chip_gen: v5e
topology: v5e:2x2
jax: 0.10.0
libtpu: 0.0.40
codegen_flags: <defaults>
</compile_context>

<pallas_src>
import numpy as np
import jax
import jax.numpy as jnp
from jax.experimental import pallas as pl
from jax.experimental.pallas import tpu as pltpu

# Fixed geometry implied by the module (input 8x8 -> 16*6*6 = 576 = fc1.in_features).
H0 = W0 = 8
PAD = 10
H1C = H0 + 2 * PAD - 1      # 27  conv1 output spatial
HP1 = H1C // 2              # 13  pool1 output spatial
H2C = HP1 - 1               # 12  conv2 output spatial
HP2 = H2C // 2              # 6   pool2 output spatial
C1, C2 = 2, 16
F1, F2, F3 = 120, 84, 10


# --------------------------- fused forward kernel ---------------------------

def net_kernel(x_ref, s1r_ref, m1_ref, b1r_ref, p1r_ref, p1c_ref,
               s2r_ref, m2_ref, b2r_ref, p2r_ref, p2c_ref,
               w1_ref, fb1_ref, w2_ref, fb2_ref, w3_ref, fb3_ref,
               out_ref, p2_scr):
    dot = lambda a, b: jnp.dot(a, b, preferred_element_type=jnp.float32)
    n = out_ref.shape[0]

    # conv1 + bias + ReLU on a (N*27, C1*27) slab: rows=(n, i1), cols=(co, j1).
    # Zero padding and the 2x2 taps are folded into the constant matrices.
    x = x_ref[...]                                               # (N*8, 8)
    c1 = dot(dot(s1r_ref[0], x), m1_ref[0]) + dot(dot(s1r_ref[1], x), m1_ref[1])
    c1 = jnp.maximum(c1 + b1r_ref[...], 0.0)

    # 2x2 max-pool via stride-2 selection matmuls -> (N*13, C1*13): rows=(n,i), cols=(ci,j).
    u0 = dot(p1r_ref[0], c1)
    u1 = dot(p1r_ref[1], c1)
    h1 = jnp.maximum(jnp.maximum(dot(u0, p1c_ref[0]), dot(u0, p1c_ref[1])),
                     jnp.maximum(dot(u1, p1c_ref[0]), dot(u1, p1c_ref[1])))

    # conv2 + bias + ReLU on a (N*12, C2*12) slab: rows=(n, i2), cols=(co, j2).
    c2 = dot(dot(s2r_ref[0], h1), m2_ref[0]) + dot(dot(s2r_ref[1], h1), m2_ref[1])
    c2 = jnp.maximum(c2 + b2r_ref[...], 0.0)

    # 2x2 max-pool -> (6*N, C2*6) slab: rows=(pi, n), cols=(co, pj).
    v0 = dot(p2r_ref[0], c2)
    v1 = dot(p2r_ref[1], c2)
    p2 = jnp.maximum(jnp.maximum(dot(v0, p2c_ref[0]), dot(v0, p2c_ref[1])),
                     jnp.maximum(dot(v1, p2c_ref[0]), dot(v1, p2c_ref[1])))
    p2_scr[...] = p2

    # fc1 over the torch NCHW flatten (co, pi, pj): one (N,96)@(96,120) block per pi.
    blk = C2 * HP2                                               # 96
    acc = dot(p2_scr[0:n, :], w1_ref[0:blk, :])
    for pi in range(1, HP2):
        acc = acc + dot(p2_scr[n * pi:n * (pi + 1), :],
                        w1_ref[blk * pi:blk * (pi + 1), :])
    h = jnp.maximum(acc + fb1_ref[...], 0.0)

    # fc2 -> ReLU -> fc3
    h = jnp.maximum(dot(h, w2_ref[...]) + fb2_ref[...], 0.0)
    out_ref[...] = dot(h, w3_ref[...]) + fb3_ref[...]


# ---------------- one-time (hoisted) constant / weight preparation ----------------

def prepare_constants(params, n):
    """Precompute all selection matrices (taps, padding, stride-2 pooling) and the
    preprocessed FC weights consumed by the fused kernel.  Runs once per model."""
    w1 = np.asarray(params['conv1_w'], np.float32)   # (C1, 1, 2, 2)
    b1 = np.asarray(params['conv1_b'], np.float32)
    w2 = np.asarray(params['conv2_w'], np.float32)   # (C2, C1, 2, 2)
    b2 = np.asarray(params['conv2_b'], np.float32)

    # conv1: row tap/pad selection and col tap+weight matrix (padding is implicit:
    # out-of-range taps simply have no 1-entry -> contribute zero).
    s1row = np.zeros((2, n * H1C, n * H0), np.float32)
    m1 = np.zeros((2, H0, C1 * H1C), np.float32)
    for ki in range(2):
        for b in range(n):
            for i1 in range(H1C):
                r = i1 + ki - PAD
                if 0 <= r < H0:
                    s1row[ki, b * H1C + i1, b * H0 + r] = 1.0
        for co in range(C1):
            for j1 in range(H1C):
                for kj in range(2):
                    c = j1 + kj - PAD
                    if 0 <= c < W0:
                        m1[ki, c, co * H1C + j1] += w1[co, 0, ki, kj]
    b1rep = np.repeat(b1, H1C)[None, :]               # (1, C1*27)

    # pool1 stride-2 row / col selections.
    p1row = np.zeros((2, n * HP1, n * H1C), np.float32)
    p1col = np.zeros((2, C1 * H1C, C1 * HP1), np.float32)
    for d in range(2):
        for b in range(n):
            for pi in range(HP1):
                p1row[d, b * HP1 + pi, b * H1C + 2 * pi + d] = 1.0
        for co in range(C1):
            for pj in range(HP1):
                p1col[d, co * H1C + 2 * pj + d, co * HP1 + pj] = 1.0

    # conv2: row tap selection and col tap+weight matrix.
    s2row = np.zeros((2, n * H2C, n * HP1), np.float32)
    m2 = np.zeros((2, C1 * HP1, C2 * H2C), np.float32)
    for ki in range(2):
        for b in range(n):
            for i2 in range(H2C):
                s2row[ki, b * H2C + i2, b * HP1 + i2 + ki] = 1.0
        for co in range(C2):
            for ci in range(C1):
                for j2 in range(H2C):
                    for kj in range(2):
                        m2[ki, ci * HP1 + j2 + kj, co * H2C + j2] += w2[co, ci, ki, kj]
    b2rep = np.repeat(b2, H2C)[None, :]               # (1, C2*12)

    # pool2 stride-2 selections; output rows ordered (pi, n) so fc1 can consume
    # contiguous per-pi row blocks.
    p2row = np.zeros((2, HP2 * n, n * H2C), np.float32)
    p2col = np.zeros((2, C2 * H2C, C2 * HP2), np.float32)
    for d in range(2):
        for pi in range(HP2):
            for b in range(n):
                p2row[d, pi * n + b, b * H2C + 2 * pi + d] = 1.0
        for co in range(C2):
            for pj in range(HP2):
                p2col[d, co * H2C + 2 * pj + d, co * HP2 + pj] = 1.0

    # FC weights: fc1 columns permuted from the torch NCHW flatten order (co, pi, pj)
    # into row blocks ordered (pi, co, pj); fc2/fc3 transposed; biases as rows.
    fc1_w = np.asarray(params['fc1_w'], np.float32)   # (120, 576)
    w1blk = fc1_w.reshape(F1, C2, HP2, HP2).transpose(2, 1, 3, 0).reshape(HP2 * C2 * HP2, F1)
    fb1 = np.asarray(params['fc1_b'], np.float32)[None, :]
    w2fc = np.asarray(params['fc2_w'], np.float32).T
    fb2 = np.asarray(params['fc2_b'], np.float32)[None, :]
    w3fc = np.asarray(params['fc3_w'], np.float32).T
    fb3 = np.asarray(params['fc3_b'], np.float32)[None, :]

    consts = (s1row, m1, b1rep, p1row, p1col, s2row, m2, b2rep, p2row, p2col,
              w1blk, fb1, w2fc, fb2, w3fc, fb3)
    return tuple(jnp.asarray(c) for c in consts)


# --------------------------------- wrapper ---------------------------------

@jax.jit
def net_forward(x, consts):
    n = x.shape[0]
    x2d = x.reshape(n * H0, W0).astype(jnp.float32)   # Cin=1 -> (N*8, 8) slab
    cost = pl.CostEstimate(flops=3_600_000, transcendentals=0, bytes_accessed=600_000)
    # Single fused, gridless invocation: total live data < 1 MiB of VMEM.
    return pl.pallas_call(
        net_kernel,
        out_shape=jax.ShapeDtypeStruct((n, F3), jnp.float32),
        in_specs=[pl.BlockSpec(memory_space=pltpu.MemorySpace.VMEM)] * 17,
        out_specs=pl.BlockSpec(memory_space=pltpu.MemorySpace.VMEM),
        scratch_shapes=[pltpu.VMEM((HP2 * n, C2 * HP2), jnp.float32)],
        cost_estimate=cost,
    )(x2d, *consts)


# ---------------- deterministic parameter init ----------------

def init_params(key):
    def uni(k, shape, fan_in):
        bound = 1.0 / jnp.sqrt(jnp.float32(fan_in))
        return jax.random.uniform(k, shape, jnp.float32, -bound, bound)

    ks = jax.random.split(key, 10)
    return {
        'conv1_w': uni(ks[0], (C1, 1, 2, 2), 1 * 2 * 2),
        'conv1_b': uni(ks[1], (C1,), 1 * 2 * 2),
        'conv2_w': uni(ks[2], (C2, C1, 2, 2), C1 * 2 * 2),
        'conv2_b': uni(ks[3], (C2,), C1 * 2 * 2),
        'fc1_w': uni(ks[4], (F1, C2 * HP2 * HP2), C2 * HP2 * HP2),
        'fc1_b': uni(ks[5], (F1,), C2 * HP2 * HP2),
        'fc2_w': uni(ks[6], (F2, F1), F1),
        'fc2_b': uni(ks[7], (F2,), F1),
        'fc3_w': uni(ks[8], (F3, F2), F2),
        'fc3_b': uni(ks[9], (F3,), F2),
    }


# ---------------- plain-JAX reference for validation ----------------

def reference_forward(x, p):
    def conv(x, w, b, pad):
        y = jax.lax.conv_general_dilated(
            x, w, window_strides=(1, 1), padding=[(pad, pad), (pad, pad)],
            dimension_numbers=('NCHW', 'OIHW', 'NCHW'))
        return y + b[None, :, None, None]

    def pool(x):
        return jax.lax.reduce_window(x, -jnp.inf, jax.lax.max,
                                     (1, 1, 2, 2), (1, 1, 2, 2), 'VALID')

    h = pool(jnp.maximum(conv(x, p['conv1_w'], p['conv1_b'], PAD), 0.0))
    h = pool(jnp.maximum(conv(h, p['conv2_w'], p['conv2_b'], 0), 0.0))
    h = h.reshape(h.shape[0], -1)
    h = jnp.maximum(h @ p['fc1_w'].T + p['fc1_b'], 0.0)
    h = jnp.maximum(h @ p['fc2_w'].T + p['fc2_b'], 0.0)
    return h @ p['fc3_w'].T + p['fc3_b']


if __name__ == "__main__":
    key = jax.random.PRNGKey(0)
    kx, kp = jax.random.split(key)

    # Input (N=2, C=1, H=8, W=8): conv1(pad=10,k=2)->27x27, pool->13x13,
    # conv2(k=2)->12x12, pool->6x6, flatten 16*6*6 = 576 (matches fc1 in_features).
    x = jax.random.normal(kx, (2, 1, H0, W0), jnp.float32)
    params = init_params(kp)
    consts = prepare_constants(params, n=2)   # hoisted, one-time weight preprocessing

    out = jax.block_until_ready(net_forward(x, consts))
    assert out.shape == (2, F3), out.shape

    ref = reference_forward(x, params)
    if not bool(jnp.allclose(out, ref, atol=1e-2, rtol=1e-2)):
        raise AssertionError("Pallas output does not match reference")

    print("KERNEL_OK")
</pallas_src>

<mosaic_0001>
module attributes {stable_mosaic.version = 11 : i64} {
  func.func @net_kernel(%arg0: memref<16x8xf32, #tpu.memory_space<vmem>>, %arg1: memref<2x54x16xf32, #tpu.memory_space<vmem>>, %arg2: memref<2x8x54xf32, #tpu.memory_space<vmem>>, %arg3: memref<1x54xf32, #tpu.memory_space<vmem>>, %arg4: memref<2x26x54xf32, #tpu.memory_space<vmem>>, %arg5: memref<2x54x26xf32, #tpu.memory_space<vmem>>, %arg6: memref<2x24x26xf32, #tpu.memory_space<vmem>>, %arg7: memref<2x26x192xf32, #tpu.memory_space<vmem>>, %arg8: memref<1x192xf32, #tpu.memory_space<vmem>>, %arg9: memref<2x12x24xf32, #tpu.memory_space<vmem>>, %arg10: memref<2x192x96xf32, #tpu.memory_space<vmem>>, %arg11: memref<576x120xf32, #tpu.memory_space<vmem>>, %arg12: memref<1x120xf32, #tpu.memory_space<vmem>>, %arg13: memref<120x84xf32, #tpu.memory_space<vmem>>, %arg14: memref<1x84xf32, #tpu.memory_space<vmem>>, %arg15: memref<84x10xf32, #tpu.memory_space<vmem>>, %arg16: memref<1x10xf32, #tpu.memory_space<vmem>>, %arg17: memref<2x10xf32, #tpu.memory_space<vmem>>, %arg18: memref<12x96xf32, #tpu.memory_space<vmem>>) attributes {dimension_semantics = [], scalar_prefetch = 0 : i64, scratch_operands = 1 : i64, tpu.core_type = #tpu.core_type<tc>} {
    %c0 = arith.constant 0 : index
    %c0_0 = arith.constant 0 : index
    %0 = vector.load %arg0[%c0, %c0_0] : memref<16x8xf32, #tpu.memory_space<vmem>>, vector<16x8xf32>
    %c0_1 = arith.constant 0 : index
    %c0_2 = arith.constant 0 : index
    %c0_3 = arith.constant 0 : index
    %1 = vector.load %arg1[%c0_1, %c0_2, %c0_3] : memref<2x54x16xf32, #tpu.memory_space<vmem>>, vector<1x54x16xf32>
    %2 = vector.shape_cast %1 : vector<1x54x16xf32> to vector<54x16xf32>
    %cst = arith.constant dense<0.000000e+00> : vector<54x8xf32>
    %3 = tpu.matmul %2, %0, %cst {dimension_numbers = #tpu.dot_dimension_numbers<[1], [0], [0], [1], [0, 0, 1, 1], [], []>} : vector<54x16xf32>, vector<16x8xf32>, vector<54x8xf32> -> vector<54x8xf32>
    %c0_4 = arith.constant 0 : index
    %c0_5 = arith.constant 0 : index
    %c0_6 = arith.constant 0 : index
    %4 = vector.load %arg2[%c0_4, %c0_5, %c0_6] : memref<2x8x54xf32, #tpu.memory_space<vmem>>, vector<1x8x54xf32>
    %5 = vector.shape_cast %4 : vector<1x8x54xf32> to vector<8x54xf32>
    %cst_7 = arith.constant dense<0.000000e+00> : vector<54x54xf32>
    %6 = tpu.matmul %3, %5, %cst_7 {dimension_numbers = #tpu.dot_dimension_numbers<[1], [0], [0], [1], [0, 0, 1, 1], [], []>} : vector<54x8xf32>, vector<8x54xf32>, vector<54x54xf32> -> vector<54x54xf32>
    %c1 = arith.constant 1 : index
    %c0_8 = arith.constant 0 : index
    %c0_9 = arith.constant 0 : index
    %7 = vector.load %arg1[%c1, %c0_8, %c0_9] : memref<2x54x16xf32, #tpu.memory_space<vmem>>, vector<1x54x16xf32>
    %8 = vector.shape_cast %7 : vector<1x54x16xf32> to vector<54x16xf32>
    %cst_10 = arith.constant dense<0.000000e+00> : vector<54x8xf32>
    %9 = tpu.matmul %8, %0, %cst_10 {dimension_numbers = #tpu.dot_dimension_numbers<[1], [0], [0], [1], [0, 0, 1, 1], [], []>} : vector<54x16xf32>, vector<16x8xf32>, vector<54x8xf32> -> vector<54x8xf32>
    %c1_11 = arith.constant 1 : index
    %c0_12 = arith.constant 0 : index
    %c0_13 = arith.constant 0 : index
    %10 = vector.load %arg2[%c1_11, %c0_12, %c0_13] : memref<2x8x54xf32, #tpu.memory_space<vmem>>, vector<1x8x54xf32>
    %11 = vector.shape_cast %10 : vector<1x8x54xf32> to vector<8x54xf32>
    %cst_14 = arith.constant dense<0.000000e+00> : vector<54x54xf32>
    %12 = tpu.matmul %9, %11, %cst_14 {dimension_numbers = #tpu.dot_dimension_numbers<[1], [0], [0], [1], [0, 0, 1, 1], [], []>} : vector<54x8xf32>, vector<8x54xf32>, vector<54x54xf32> -> vector<54x54xf32>
    %13 = arith.addf %6, %12 : vector<54x54xf32>
    %c0_15 = arith.constant 0 : index
    %c0_16 = arith.constant 0 : index
    %14 = vector.load %arg3[%c0_15, %c0_16] : memref<1x54xf32, #tpu.memory_space<vmem>>, vector<1x54xf32>
    %15 = vector.broadcast %14 : vector<1x54xf32> to vector<54x54xf32>
    %16 = arith.addf %13, %15 : vector<54x54xf32>
    %cst_17 = arith.constant 0.000000e+00 : f32
    %17 = vector.broadcast %cst_17 : f32 to vector<54x54xf32>
    %18 = arith.maximumf %16, %17 : vector<54x54xf32>
    %c0_18 = arith.constant 0 : index
    %c0_19 = arith.constant 0 : index
    %c0_20 = arith.constant 0 : index
    %19 = vector.load %arg4[%c0_18, %c0_19, %c0_20] : memref<2x26x54xf32, #tpu.memory_space<vmem>>, vector<1x26x54xf32>
    %20 = vector.shape_cast %19 : vector<1x26x54xf32> to vector<26x54xf32>
    %cst_21 = arith.constant dense<0.000000e+00> : vector<26x54xf32>
    %21 = tpu.matmul %20, %18, %cst_21 {dimension_numbers = #tpu.dot_dimension_numbers<[1], [0], [0], [1], [0, 0, 1, 1], [], []>} : vector<26x54xf32>, vector<54x54xf32>, vector<26x54xf32> -> vector<26x54xf32>
    %c1_22 = arith.constant 1 : index
    %c0_23 = arith.constant 0 : index
    %c0_24 = arith.constant 0 : index
    %22 = vector.load %arg4[%c1_22, %c0_23, %c0_24] : memref<2x26x54xf32, #tpu.memory_space<vmem>>, vector<1x26x54xf32>
    %23 = vector.shape_cast %22 : vector<1x26x54xf32> to vector<26x54xf32>
    %cst_25 = arith.constant dense<0.000000e+00> : vector<26x54xf32>
    %24 = tpu.matmul %23, %18, %cst_25 {dimension_numbers = #tpu.dot_dimension_numbers<[1], [0], [0], [1], [0, 0, 1, 1], [], []>} : vector<26x54xf32>, vector<54x54xf32>, vector<26x54xf32> -> vector<26x54xf32>
    %c0_26 = arith.constant 0 : index
    %c0_27 = arith.constant 0 : index
    %c0_28 = arith.constant 0 : index
    %25 = vector.load %arg5[%c0_26, %c0_27, %c0_28] : memref<2x54x26xf32, #tpu.memory_space<vmem>>, vector<1x54x26xf32>
    %26 = vector.shape_cast %25 : vector<1x54x26xf32> to vector<54x26xf32>
    %cst_29 = arith.constant dense<0.000000e+00> : vector<26x26xf32>
    %27 = tpu.matmul %21, %26, %cst_29 {dimension_numbers = #tpu.dot_dimension_numbers<[1], [0], [0], [1], [0, 0, 1, 1], [], []>} : vector<26x54xf32>, vector<54x26xf32>, vector<26x26xf32> -> vector<26x26xf32>
    %c1_30 = arith.constant 1 : index
    %c0_31 = arith.constant 0 : index
    %c0_32 = arith.constant 0 : index
    %28 = vector.load %arg5[%c1_30, %c0_31, %c0_32] : memref<2x54x26xf32, #tpu.memory_space<vmem>>, vector<1x54x26xf32>
    %29 = vector.shape_cast %28 : vector<1x54x26xf32> to vector<54x26xf32>
    %cst_33 = arith.constant dense<0.000000e+00> : vector<26x26xf32>
    %30 = tpu.matmul %21, %29, %cst_33 {dimension_numbers = #tpu.dot_dimension_numbers<[1], [0], [0], [1], [0, 0, 1, 1], [], []>} : vector<26x54xf32>, vector<54x26xf32>, vector<26x26xf32> -> vector<26x26xf32>
    %31 = arith.maximumf %27, %30 : vector<26x26xf32>
    %c0_34 = arith.constant 0 : index
    %c0_35 = arith.constant 0 : index
    %c0_36 = arith.constant 0 : index
    %32 = vector.load %arg5[%c0_34, %c0_35, %c0_36] : memref<2x54x26xf32, #tpu.memory_space<vmem>>, vector<1x54x26xf32>
    %33 = vector.shape_cast %32 : vector<1x54x26xf32> to vector<54x26xf32>
    %cst_37 = arith.constant dense<0.000000e+00> : vector<26x26xf32>
    %34 = tpu.matmul %24, %33, %cst_37 {dimension_numbers = #tpu.dot_dimension_numbers<[1], [0], [0], [1], [0, 0, 1, 1], [], []>} : vector<26x54xf32>, vector<54x26xf32>, vector<26x26xf32> -> vector<26x26xf32>
    %c1_38 = arith.constant 1 : index
    %c0_39 = arith.constant 0 : index
    %c0_40 = arith.constant 0 : index
    %35 = vector.load %arg5[%c1_38, %c0_39, %c0_40] : memref<2x54x26xf32, #tpu.memory_space<vmem>>, vector<1x54x26xf32>
    %36 = vector.shape_cast %35 : vector<1x54x26xf32> to vector<54x26xf32>
    %cst_41 = arith.constant dense<0.000000e+00> : vector<26x26xf32>
    %37 = tpu.matmul %24, %36, %cst_41 {dimension_numbers = #tpu.dot_dimension_numbers<[1], [0], [0], [1], [0, 0, 1, 1], [], []>} : vector<26x54xf32>, vector<54x26xf32>, vector<26x26xf32> -> vector<26x26xf32>
    %38 = arith.maximumf %34, %37 : vector<26x26xf32>
    %39 = arith.maximumf %31, %38 : vector<26x26xf32>
    %c0_42 = arith.constant 0 : index
    %c0_43 = arith.constant 0 : index
    %c0_44 = arith.constant 0 : index
    %40 = vector.load %arg6[%c0_42, %c0_43, %c0_44] : memref<2x24x26xf32, #tpu.memory_space<vmem>>, vector<1x24x26xf32>
    %41 = vector.shape_cast %40 : vector<1x24x26xf32> to vector<24x26xf32>
    %cst_45 = arith.constant dense<0.000000e+00> : vector<24x26xf32>
    %42 = tpu.matmul %41, %39, %cst_45 {dimension_numbers = #tpu.dot_dimension_numbers<[1], [0], [0], [1], [0, 0, 1, 1], [], []>} : vector<24x26xf32>, vector<26x26xf32>, vector<24x26xf32> -> vector<24x26xf32>
    %c0_46 = arith.constant 0 : index
    %c0_47 = arith.constant 0 : index
    %c0_48 = arith.constant 0 : index
    %43 = vector.load %arg7[%c0_46, %c0_47, %c0_48] : memref<2x26x192xf32, #tpu.memory_space<vmem>>, vector<1x26x192xf32>
    %44 = vector.shape_cast %43 : vector<1x26x192xf32> to vector<26x192xf32>
    %cst_49 = arith.constant dense<0.000000e+00> : vector<24x192xf32>
    %45 = tpu.matmul %42, %44, %cst_49 {dimension_numbers = #tpu.dot_dimension_numbers<[1], [0], [0], [1], [0, 0, 1, 1], [], []>} : vector<24x26xf32>, vector<26x192xf32>, vector<24x192xf32> -> vector<24x192xf32>
    %c1_50 = arith.constant 1 : index
    %c0_51 = arith.constant 0 : index
    %c0_52 = arith.constant 0 : index
    %46 = vector.load %arg6[%c1_50, %c0_51, %c0_52] : memref<2x24x26xf32, #tpu.memory_space<vmem>>, vector<1x24x26xf32>
    %47 = vector.shape_cast %46 : vector<1x24x26xf32> to vector<24x26xf32>
    %cst_53 = arith.constant dense<0.000000e+00> : vector<24x26xf32>
    %48 = tpu.matmul %47, %39, %cst_53 {dimension_numbers = #tpu.dot_dimension_numbers<[1], [0], [0], [1], [0, 0, 1, 1], [], []>} : vector<24x26xf32>, vector<26x26xf32>, vector<24x26xf32> -> vector<24x26xf32>
    %c1_54 = arith.constant 1 : index
    %c0_55 = arith.constant 0 : index
    %c0_56 = arith.constant 0 : index
    %49 = vector.load %arg7[%c1_54, %c0_55, %c0_56] : memref<2x26x192xf32, #tpu.memory_space<vmem>>, vector<1x26x192xf32>
    %50 = vector.shape_cast %49 : vector<1x26x192xf32> to vector<26x192xf32>
    %cst_57 = arith.constant dense<0.000000e+00> : vector<24x192xf32>
    %51 = tpu.matmul %48, %50, %cst_57 {dimension_numbers = #tpu.dot_dimension_numbers<[1], [0], [0], [1], [0, 0, 1, 1], [], []>} : vector<24x26xf32>, vector<26x192xf32>, vector<24x192xf32> -> vector<24x192xf32>
    %52 = arith.addf %45, %51 : vector<24x192xf32>
    %c0_58 = arith.constant 0 : index
    %c0_59 = arith.constant 0 : index
    %53 = vector.load %arg8[%c0_58, %c0_59] : memref<1x192xf32, #tpu.memory_space<vmem>>, vector<1x192xf32>
    %54 = vector.broadcast %53 : vector<1x192xf32> to vector<24x192xf32>
    %55 = arith.addf %52, %54 : vector<24x192xf32>
    %cst_60 = arith.constant 0.000000e+00 : f32
    %56 = vector.broadcast %cst_60 : f32 to vector<24x192xf32>
    %57 = arith.maximumf %55, %56 : vector<24x192xf32>
    %c0_61 = arith.constant 0 : index
    %c0_62 = arith.constant 0 : index
    %c0_63 = arith.constant 0 : index
    %58 = vector.load %arg9[%c0_61, %c0_62, %c0_63] : memref<2x12x24xf32, #tpu.memory_space<vmem>>, vector<1x12x24xf32>
    %59 = vector.shape_cast %58 : vector<1x12x24xf32> to vector<12x24xf32>
    %cst_64 = arith.constant dense<0.000000e+00> : vector<12x192xf32>
    %60 = tpu.matmul %59, %57, %cst_64 {dimension_numbers = #tpu.dot_dimension_numbers<[1], [0], [0], [1], [0, 0, 1, 1], [], []>} : vector<12x24xf32>, vector<24x192xf32>, vector<12x192xf32> -> vector<12x192xf32>
    %c1_65 = arith.constant 1 : index
    %c0_66 = arith.constant 0 : index
    %c0_67 = arith.constant 0 : index
    %61 = vector.load %arg9[%c1_65, %c0_66, %c0_67] : memref<2x12x24xf32, #tpu.memory_space<vmem>>, vector<1x12x24xf32>
    %62 = vector.shape_cast %61 : vector<1x12x24xf32> to vector<12x24xf32>
    %cst_68 = arith.constant dense<0.000000e+00> : vector<12x192xf32>
    %63 = tpu.matmul %62, %57, %cst_68 {dimension_numbers = #tpu.dot_dimension_numbers<[1], [0], [0], [1], [0, 0, 1, 1], [], []>} : vector<12x24xf32>, vector<24x192xf32>, vector<12x192xf32> -> vector<12x192xf32>
    %c0_69 = arith.constant 0 : index
    %c0_70 = arith.constant 0 : index
    %c0_71 = arith.constant 0 : index
    %64 = vector.load %arg10[%c0_69, %c0_70, %c0_71] : memref<2x192x96xf32, #tpu.memory_space<vmem>>, vector<1x192x96xf32>
    %65 = vector.shape_cast %64 : vector<1x192x96xf32> to vector<192x96xf32>
    %cst_72 = arith.constant dense<0.000000e+00> : vector<12x96xf32>
    %66 = tpu.matmul %60, %65, %cst_72 {dimension_numbers = #tpu.dot_dimension_numbers<[1], [0], [0], [1], [0, 0, 1, 1], [], []>} : vector<12x192xf32>, vector<192x96xf32>, vector<12x96xf32> -> vector<12x96xf32>
    %c1_73 = arith.constant 1 : index
    %c0_74 = arith.constant 0 : index
    %c0_75 = arith.constant 0 : index
    %67 = vector.load %arg10[%c1_73, %c0_74, %c0_75] : memref<2x192x96xf32, #tpu.memory_space<vmem>>, vector<1x192x96xf32>
    %68 = vector.shape_cast %67 : vector<1x192x96xf32> to vector<192x96xf32>
    %cst_76 = arith.constant dense<0.000000e+00> : vector<12x96xf32>
    %69 = tpu.matmul %60, %68, %cst_76 {dimension_numbers = #tpu.dot_dimension_numbers<[1], [0], [0], [1], [0, 0, 1, 1], [], []>} : vector<12x192xf32>, vector<192x96xf32>, vector<12x96xf32> -> vector<12x96xf32>
    %70 = arith.maximumf %66, %69 : vector<12x96xf32>
    %c0_77 = arith.constant 0 : index
    %c0_78 = arith.constant 0 : index
    %c0_79 = arith.constant 0 : index
    %71 = vector.load %arg10[%c0_77, %c0_78, %c0_79] : memref<2x192x96xf32, #tpu.memory_space<vmem>>, vector<1x192x96xf32>
    %72 = vector.shape_cast %71 : vector<1x192x96xf32> to vector<192x96xf32>
    %cst_80 = arith.constant dense<0.000000e+00> : vector<12x96xf32>
    %73 = tpu.matmul %63, %72, %cst_80 {dimension_numbers = #tpu.dot_dimension_numbers<[1], [0], [0], [1], [0, 0, 1, 1], [], []>} : vector<12x192xf32>, vector<192x96xf32>, vector<12x96xf32> -> vector<12x96xf32>
    %c1_81 = arith.constant 1 : index
    %c0_82 = arith.constant 0 : index
    %c0_83 = arith.constant 0 : index
    %74 = vector.load %arg10[%c1_81, %c0_82, %c0_83] : memref<2x192x96xf32, #tpu.memory_space<vmem>>, vector<1x192x96xf32>
    %75 = vector.shape_cast %74 : vector<1x192x96xf32> to vector<192x96xf32>
    %cst_84 = arith.constant dense<0.000000e+00> : vector<12x96xf32>
    %76 = tpu.matmul %63, %75, %cst_84 {dimension_numbers = #tpu.dot_dimension_numbers<[1], [0], [0], [1], [0, 0, 1, 1], [], []>} : vector<12x192xf32>, vector<192x96xf32>, vector<12x96xf32> -> vector<12x96xf32>
    %77 = arith.maximumf %73, %76 : vector<12x96xf32>
    %78 = arith.maximumf %70, %77 : vector<12x96xf32>
    %c0_85 = arith.constant 0 : index
    %c0_86 = arith.constant 0 : index
    %79 = vector.load %arg18[%c0_85, %c0_86] : memref<12x96xf32, #tpu.memory_space<vmem>>, vector<12x96xf32>
    tpu.vector_store %arg18[%c0_85, %c0_86], %78 {strides = array<i32>} : memref<12x96xf32, #tpu.memory_space<vmem>>, vector<12x96xf32>,
    %c0_87 = arith.constant 0 : index
    %c0_88 = arith.constant 0 : index
    %80 = vector.load %arg18[%c0_87, %c0_88] : memref<12x96xf32, #tpu.memory_space<vmem>>, vector<2x96xf32>
    %c0_89 = arith.constant 0 : index
    %c0_90 = arith.constant 0 : index
    %81 = vector.load %arg11[%c0_89, %c0_90] : memref<576x120xf32, #tpu.memory_space<vmem>>, vector<96x120xf32>
    %cst_91 = arith.constant dense<0.000000e+00> : vector<2x120xf32>
    %82 = tpu.matmul %80, %81, %cst_91 {dimension_numbers = #tpu.dot_dimension_numbers<[1], [0], [0], [1], [0, 0, 1, 1], [], []>} : vector<2x96xf32>, vector<96x120xf32>, vector<2x120xf32> -> vector<2x120xf32>
    %c2 = arith.constant 2 : index
    %c0_92 = arith.constant 0 : index
    %83 = vector.load %arg18[%c2, %c0_92] : memref<12x96xf32, #tpu.memory_space<vmem>>, vector<2x96xf32>
    %c96 = arith.constant 96 : index
    %c0_93 = arith.constant 0 : index
    %84 = vector.load %arg11[%c96, %c0_93] : memref<576x120xf32, #tpu.memory_space<vmem>>, vector<96x120xf32>
    %cst_94 = arith.constant dense<0.000000e+00> : vector<2x120xf32>
    %85 = tpu.matmul %83, %84, %cst_94 {dimension_numbers = #tpu.dot_dimension_numbers<[1], [0], [0], [1], [0, 0, 1, 1], [], []>} : vector<2x96xf32>, vector<96x120xf32>, vector<2x120xf32> -> vector<2x120xf32>
    %86 = arith.addf %82, %85 : vector<2x120xf32>
    %c4 = arith.constant 4 : index
    %c0_95 = arith.constant 0 : index
    %87 = vector.load %arg18[%c4, %c0_95] : memref<12x96xf32, #tpu.memory_space<vmem>>, vector<2x96xf32>
    %c192 = arith.constant 192 : index
    %c0_96 = arith.constant 0 : index
    %88 = vector.load %arg11[%c192, %c0_96] : memref<576x120xf32, #tpu.memory_space<vmem>>, vector<96x120xf32>
    %cst_97 = arith.constant dense<0.000000e+00> : vector<2x120xf32>
    %89 = tpu.matmul %87, %88, %cst_97 {dimension_numbers = #tpu.dot_dimension_numbers<[1], [0], [0], [1], [0, 0, 1, 1], [], []>} : vector<2x96xf32>, vector<96x120xf32>, vector<2x120xf32> -> vector<2x120xf32>
    %90 = arith.addf %86, %89 : vector<2x120xf32>
    %c6 = arith.constant 6 : index
    %c0_98 = arith.constant 0 : index
    %91 = vector.load %arg18[%c6, %c0_98] : memref<12x96xf32, #tpu.memory_space<vmem>>, vector<2x96xf32>
    %c288 = arith.constant 288 : index
    %c0_99 = arith.constant 0 : index
    %92 = vector.load %arg11[%c288, %c0_99] : memref<576x120xf32, #tpu.memory_space<vmem>>, vector<96x120xf32>
    %cst_100 = arith.constant dense<0.000000e+00> : vector<2x120xf32>
    %93 = tpu.matmul %91, %92, %cst_100 {dimension_numbers = #tpu.dot_dimension_numbers<[1], [0], [0], [1], [0, 0, 1, 1], [], []>} : vector<2x96xf32>, vector<96x120xf32>, vector<2x120xf32> -> vector<2x120xf32>
    %94 = arith.addf %90, %93 : vector<2x120xf32>
    %c8 = arith.constant 8 : index
    %c0_101 = arith.constant 0 : index
    %95 = vector.load %arg18[%c8, %c0_101] : memref<12x96xf32, #tpu.memory_space<vmem>>, vector<2x96xf32>
    %c384 = arith.constant 384 : index
    %c0_102 = arith.constant 0 : index
    %96 = vector.load %arg11[%c384, %c0_102] : memref<576x120xf32, #tpu.memory_space<vmem>>, vector<96x120xf32>
    %cst_103 = arith.constant dense<0.000000e+00> : vector<2x120xf32>
    %97 = tpu.matmul %95, %96, %cst_103 {dimension_numbers = #tpu.dot_dimension_numbers<[1], [0], [0], [1], [0, 0, 1, 1], [], []>} : vector<2x96xf32>, vector<96x120xf32>, vector<2x120xf32> -> vector<2x120xf32>
    %98 = arith.addf %94, %97 : vector<2x120xf32>
    %c10 = arith.constant 10 : index
    %c0_104 = arith.constant 0 : index
    %99 = vector.load %arg18[%c10, %c0_104] : memref<12x96xf32, #tpu.memory_space<vmem>>, vector<2x96xf32>
    %c480 = arith.constant 480 : index
    %c0_105 = arith.constant 0 : index
    %100 = vector.load %arg11[%c480, %c0_105] : memref<576x120xf32, #tpu.memory_space<vmem>>, vector<96x120xf32>
    %cst_106 = arith.constant dense<0.000000e+00> : vector<2x120xf32>
    %101 = tpu.matmul %99, %100, %cst_106 {dimension_numbers = #tpu.dot_dimension_numbers<[1], [0], [0], [1], [0, 0, 1, 1], [], []>} : vector<2x96xf32>, vector<96x120xf32>, vector<2x120xf32> -> vector<2x120xf32>
    %102 = arith.addf %98, %101 : vector<2x120xf32>
    %c0_107 = arith.constant 0 : index
    %c0_108 = arith.constant 0 : index
    %103 = vector.load %arg12[%c0_107, %c0_108] : memref<1x120xf32, #tpu.memory_space<vmem>>, vector<1x120xf32>
    %104 = vector.broadcast %103 : vector<1x120xf32> to vector<2x120xf32>
    %105 = arith.addf %102, %104 : vector<2x120xf32>
    %cst_109 = arith.constant 0.000000e+00 : f32
    %106 = vector.broadcast %cst_109 : f32 to vector<2x120xf32>
    %107 = arith.maximumf %105, %106 : vector<2x120xf32>
    %c0_110 = arith.constant 0 : index
    %c0_111 = arith.constant 0 : index
    %108 = vector.load %arg13[%c0_110, %c0_111] : memref<120x84xf32, #tpu.memory_space<vmem>>, vector<120x84xf32>
    %cst_112 = arith.constant dense<0.000000e+00> : vector<2x84xf32>
    %109 = tpu.matmul %107, %108, %cst_112 {dimension_numbers = #tpu.dot_dimension_numbers<[1], [0], [0], [1], [0, 0, 1, 1], [], []>} : vector<2x120xf32>, vector<120x84xf32>, vector<2x84xf32> -> vector<2x84xf32>
    %c0_113 = arith.constant 0 : index
    %c0_114 = arith.constant 0 : index
    %110 = vector.load %arg14[%c0_113, %c0_114] : memref<1x84xf32, #tpu.memory_space<vmem>>, vector<1x84xf32>
    %111 = vector.broadcast %110 : vector<1x84xf32> to vector<2x84xf32>
    %112 = arith.addf %109, %111 : vector<2x84xf32>
    %cst_115 = arith.constant 0.000000e+00 : f32
    %113 = vector.broadcast %cst_115 : f32 to vector<2x84xf32>
    %114 = arith.maximumf %112, %113 : vector<2x84xf32>
    %c0_116 = arith.constant 0 : index
    %c0_117 = arith.constant 0 : index
    %115 = vector.load %arg15[%c0_116, %c0_117] : memref<84x10xf32, #tpu.memory_space<vmem>>, vector<84x10xf32>
    %cst_118 = arith.constant dense<0.000000e+00> : vector<2x10xf32>
    %116 = tpu.matmul %114, %115, %cst_118 {dimension_numbers = #tpu.dot_dimension_numbers<[1], [0], [0], [1], [0, 0, 1, 1], [], []>} : vector<2x84xf32>, vector<84x10xf32>, vector<2x10xf32> -> vector<2x10xf32>
    %c0_119 = arith.constant 0 : index
    %c0_120 = arith.constant 0 : index
    %117 = vector.load %arg16[%c0_119, %c0_120] : memref<1x10xf32, #tpu.memory_space<vmem>>, vector<1x10xf32>
    %118 = vector.broadcast %117 : vector<1x10xf32> to vector<2x10xf32>
    %119 = arith.addf %116, %118 : vector<2x10xf32>
    %c0_121 = arith.constant 0 : index
    %c0_122 = arith.constant 0 : index
    %120 = vector.load %arg17[%c0_121, %c0_122] : memref<2x10xf32, #tpu.memory_space<vmem>>, vector<2x10xf32>
    tpu.vector_store %arg17[%c0_121, %c0_122], %119 {strides = array<i32>} : memref<2x10xf32, #tpu.memory_space<vmem>>, vector<2x10xf32>,
    return
  }
}

</mosaic_0001>

<bundles_post_ra>
// kernel: net_forward.1
= control target key start
LH: loop header
LB: loop body
LE: loop exit
PB: predicated region body
PF: predicated region fallthrough
CT: control target
= control target key end

     0   :  { %s2772_s0 = inlined_call_operand.vmem [shape: f32[16,8], index: 0, kind: input, shape index: {}]   ;;  %s2773_s1 = inlined_call_operand.vmem [shape: f32[2,54,16], index: 1, kind: input, shape index: {}]   ;;  %s2774_s2 = inlined_call_operand.hbm [shape: f32[2,8,54], index: 2, kind: input, shape index: {}]   ;;  %s2775_s3 = inlined_call_operand.vmem [shape: f32[1,54], index: 3, kind: input, shape index: {}]   ;;  %s2776_s4 = inlined_call_operand.vmem [shape: f32[2,26,54], index: 4, kind: input, shape index: {}]   ;;  %s2777_s5 = inlined_call_operand.vmem [shape: f32[2,54,26], index: 5, kind: input, shape index: {}]   ;;  %s2778_s6 = inlined_call_operand.vmem [shape: f32[2,24,26], index: 6, kind: input, shape index: {}]   ;;  %s2779_s7 = inlined_call_operand.vmem [shape: f32[2,26,192], index: 7, kind: input, shape index: {}]   ;;  %s2780_s8 = inlined_call_operand.vmem [shape: f32[1,192], index: 8, kind: input, shape index: {}]   ;;  %s2781_s9 = inlined_call_operand.vmem [shape: f32[2,12,24], index: 9, kind: input, shape index: {}]   ;;  %s2782_s10 = inlined_call_operand.vmem [shape: f32[2,192,96], index: 10, kind: input, shape index: {}]   ;;  %s2783_s11 = inlined_call_operand.vmem [shape: f32[576,120], index: 11, kind: input, shape index: {}]   ;;  %s2784_s12 = inlined_call_operand.vmem [shape: f32[1,120], index: 12, kind: input, shape index: {}]   ;;  %s2785_s13 = inlined_call_operand.vmem [shape: f32[120,84], index: 13, kind: input, shape index: {}]   ;;  %s2786_s14 = inlined_call_operand.vmem [shape: f32[1,84], index: 14, kind: input, shape index: {}]   ;;  %s2787_s15 = inlined_call_operand.vmem [shape: f32[84,10], index: 15, kind: input, shape index: {}]   ;;  %s2788_s16 = inlined_call_operand.vmem [shape: f32[1,10], index: 16, kind: input, shape index: {}]   ;;  %s2789_s17 = inlined_call_operand.hbm [shape: f32[2,10], index: 17, kind: output, shape index: {}]  }
   0x1   :  { %2792 = sst [smem:[#allocation9_spill]] %s2772_s0 }
   0x2   :  { %2793 = sst [smem:[#allocation10_spill]] %s2773_s1 }
   0x3   :  { %22 = vsyncpa [#allocation4], 0 }
   0x4   :  { %23 = vsyncpa [#allocation5], 0  ;;  %s32_s26 = sshll.u32 %s2774_s2, 4  ;;  %s1800_s27 = smov [#allocation3]   ;;  %s33_s26 = int_to_ptr.hbm [resolvable:$true] %s32_s26 }
   0x5   :  { %s34_s28 = sshll.u32 %s1800_s27, 4  ;;  %s1801_s29 = smov 128   ;;  %s35_s28 = int_to_ptr.vmem [resolvable:$true] %s34_s28 }
   0x6   :  { %s1802_s0 = smov 8  }
   0x7   :  { %40 = dma.hbm_to_vmem [thread:$0]  %s33_s26, 256, %s35_s28, [#allocation4], %s1801_s29, %s1801_s29, %s1802_s0  }
   0x8   :  { %1796 = dma.done.wait [#allocation4], 256  }
   0x9   :  { %1797 = vsyncadd [#allocation4], 4294967040  ;;  %s2794_s19 = sld [smem:[#allocation9_spill]]  ;;  %vm82_vm0 = vcmask 130048   ;;  %v211_v16 = vld [vmem:[#allocation3 + $0x8] sm:$0xff]  ;;  %v142_v17 = vld [vmem:[#allocation3] sm:$0xff] }
   0xa   :  { %s2795_s22 = sld [smem:[#allocation10_spill]]  ;;  %249 = vmatpush.msra.mxu2 %v211_v16  ;;  %308 = vmatpush.msra.mxu3 %v142_v17  ;;  %vm212_vm1 = vcmask 64512   ;;  %v1744_v49 = vld [vmem:[%s2775_s3] ss:$0 sm:$0xff]  ;;  %vm366_vm2 = vcmask 1045504   ;;  %vm353_vm3 = vcmask 441344  }
   0xb   :  { %v1623_v16 = vld [vmem:[%s2777_s5 + $0x48] sm:$0xff]  ;;  %vm631_vm4 = vcmask 1041408   ;;  %vm621_vm5 = vcmask 211968   ;;  %vm871_vm6 = vcmask 195584   ;;  %vm1003_vm7 = vcmask 523264  }
   0xc   :  { %v350_v17 = vld [vmem:[%s2776_s4 + $0x8] sm:$0xff]  ;;  %vm1231_vm8 = vcmask 785408   ;;  %vm1233_vm9 = vcmask 781312   ;;  %vm1524_vm10 = vcmask 1043456   ;;  %vm1480_vm11 = vcmask 982016  }
   0xd   :  { %vm1520_vm12 = vcmask 687104   ;;  %vm1548_vm13 = vcmask 74752  }
   0xf   :  { %v74_v0 = vld [vmem:[%s2794_s19 + $0x8] sm:$0xff]  ;;  %v73_v1 = vld [vmem:[%s2794_s19] sm:$0xff] }
  0x10   :  { %118 = vmatpush.msra.mxu0 %v74_v0  ;;  %186 = vmatpush.msra.mxu1 %v74_v0  ;;  %v75_v2 = vld [vmem:[%s2795_s22] sm:$0xff]  ;;  %v1574_v3 = vld [vmem:[%s2795_s22 + $0x38] sm:$0xff]  ;;  %v76_v4 = vld [vmem:[%s2795_s22 + $0x8] sm:$0xff] }
  0x11   :  { %v1575_v5 = vld [vmem:[%s2795_s22 + $0x40] sm:$0xff]  ;;  %v77_v6 = vld [vmem:[%s2795_s22 + $0x10] sm:$0xff]  ;;  %v1576_v7 = vld [vmem:[%s2795_s22 + $0x48] sm:$0xff] }
  0x12   :  { %119 = vmatpush.msra.mxu0 %v73_v1  ;;  %187 = vmatpush.msra.mxu1 %v73_v1  ;;  %v78_v8 = vld [vmem:[%s2795_s22 + $0x18] sm:$0xff]  ;;  %v1577_v9 = vld [vmem:[%s2795_s22 + $0x50] sm:$0xff]  ;;  %v79_v10 = vld [vmem:[%s2795_s22 + $0x20] sm:$0xff] }
  0x13   :  { %1567 = vmatmul.msk.f32.vlgmr.msra.gmra.mxu0 %vm82_vm0, %v75_v2  ;;  %1581 = vmatmul.msk.f32.vlgmr.msra.gmra.mxu1 %vm82_vm0, %v1574_v3  ;;  %v1578_v11 = vld [vmem:[%s2795_s22 + $0x58] sm:$0xff]  ;;  %v80_v12 = vld [vmem:[%s2795_s22 + $0x28] sm:$0xff]  ;;  %v1579_v13 = vld [vmem:[%s2795_s22 + $0x60] sm:$0xff] }
  0x14   :  { %v81_v14 = vld [vmem:[%s2795_s22 + $0x30] sm:$0x3f]  ;;  %v1580_v15 = vld [vmem:[%s2795_s22 + $0x68] sm:$0x3f] }
  0x15   :  { %v1981_v0 = vld [vmem:[%s2777_s5 + $0x30] sm:$0x3f]  ;;  %v1627_v3 = vld [vmem:[%s2777_s5 + $0x68] sm:$0x3f] }
  0x16   :  { %1616 = vmatpush.msk.msrb.mxu0 %vm366_vm2, %v1981_v0  ;;  %1628 = vmatpush.msk.msrb.mxu1 %vm366_vm2, %v1627_v3 }
  0x1b   :  { %1568 = vmatmul.msk.f32.gmra.mxu0 %vm82_vm0, %v76_v4  ;;  %1582 = vmatmul.msk.f32.gmra.mxu1 %vm82_vm0, %v1575_v5  ;;  %v1989_v4 = vld [vmem:[%s2777_s5 + $0x28] sm:$0xff] }
  0x1c   :  { %477 = vmatpush.msrb.mxu0 %v1989_v4 }
  0x23   :  { %1569 = vmatmul.msk.f32.gmra.mxu0 %vm82_vm0, %v77_v6  ;;  %1583 = vmatmul.msk.f32.gmra.mxu1 %vm82_vm0, %v1576_v7  ;;  %v1626_v6 = vld [vmem:[%s2777_s5 + $0x60] sm:$0xff] }
  0x24   :  { %v449_v7 = vld [vmem:[%s2777_s5 + $0x20] sm:$0xff]  ;;  %517 = vmatpush.msrb.mxu1 %v1626_v6 }
  0x25   :  { %478 = vmatpush.msrb.mxu0 %v449_v7 }
  0x2b   :  { %1570 = vmatmul.msk.f32.gmra.mxu0 %vm82_vm0, %v78_v8  ;;  %1584 = vmatmul.msk.f32.gmra.mxu1 %vm82_vm0, %v1577_v9  ;;  %v349_v9 = vld [vmem:[%s2776_s4] sm:$0xff] }
  0x33   :  { %1571 = vmatmul.msk.f32.gmra.mxu0 %vm82_vm0, %v79_v10  ;;  %1585 = vmatmul.msk.f32.gmra.mxu1 %vm82_vm0, %v1578_v11  ;;  %v1607_v10 = vld [vmem:[%s2776_s4 + $0x20] sm:$0xff]  ;;  %v1625_v11 = vld [vmem:[%s2777_s5 + $0x58] sm:$0xff] }
  0x34   :  { %518 = vmatpush.msrb.mxu1 %v1625_v11 }
  0x3b   :  { %1572 = vmatmul.msk.f32.gmra.mxu0 %vm82_vm0, %v80_v12  ;;  %1586 = vmatmul.msk.f32.gmra.mxu1 %vm82_vm0, %v1579_v13  ;;  %v448_v12 = vld [vmem:[%s2777_s5 + $0x18] sm:$0xff]  ;;  %v447_v13 = vld [vmem:[%s2777_s5 + $0x10] sm:$0xff] }
  0x3c   :  { %479 = vmatpush.msrb.mxu0 %v448_v12 }
  0x3e   :  { %480 = vmatpush.msrb.mxu0 %v447_v13 }
  0x43   :  { %1573 = vmatmul.msk.f32.gmra.mxu0 %vm82_vm0, %v81_v14  ;;  %1587 = vmatmul.msk.f32.gmra.mxu1 %vm82_vm0, %v1580_v15  ;;  %v1624_v14 = vld [vmem:[%s2777_s5 + $0x50] sm:$0xff]  ;;  %v446_v15 = vld [vmem:[%s2777_s5 + $0x8] sm:$0xff] }
  0x44   :  { %519 = vmatpush.msrb.mxu1 %v1624_v14  ;;  %481 = vmatpush.msrb.mxu0 %v446_v15 }
  0x46   :  { %520 = vmatpush.msrb.mxu1 %v1623_v16 }
  0x90   :  { %v121_v18 = vpop.f32.mrf.mxu0  ;;  %v189_v19 = vpop.f32.mrf.mxu1 }
  0x91   :  { %1588 = vmatmul.msk.f32.vlgmr.msra.gmra.mxu2 %vm212_vm1, %v189_v19  ;;  %1595 = vmatmul.msk.f32.vlgmr.msra.gmra.mxu3 %vm212_vm1, %v121_v18  ;;  %v1608_v18 = vld [vmem:[%s2776_s4 + $0x28] sm:$0xff]  ;;  %v1622_v19 = vld [vmem:[%s2777_s5 + $0x40] sm:$0xff] }
  0x92   :  { %521 = vmatpush.msrb.mxu1 %v1622_v19 }
  0x98   :  { %v124_v20 = vpop.f32.mrf.mxu0  ;;  %v192_v21 = vpop.f32.mrf.mxu1 }
  0x99   :  { %1589 = vmatmul.msk.f32.gmra.mxu2 %vm212_vm1, %v192_v21  ;;  %1596 = vmatmul.msk.f32.gmra.mxu3 %vm212_vm1, %v124_v20  ;;  %v351_v20 = vld [vmem:[%s2776_s4 + $0x10] sm:$0xff] }
  0x9a   :  { %v1609_v21 = vld [vmem:[%s2776_s4 + $0x30] sm:$0xff] }
  0xa0   :  { %v127_v22 = vpop.f32.mrf.mxu0  ;;  %v195_v23 = vpop.f32.mrf.mxu1 }
  0xa1   :  { %1590 = vmatmul.msk.f32.gmra.mxu2 %vm212_vm1, %v195_v23  ;;  %1597 = vmatmul.msk.f32.gmra.mxu3 %vm212_vm1, %v127_v22  ;;  %v352_v22 = vld [vmem:[%s2776_s4 + $0x18] sm:$0x3] }
  0xa2   :  { %v1610_v23 = vld [vmem:[%s2776_s4 + $0x38] sm:$0x3] }
  0xa8   :  { %v130_v24 = vpop.f32.mrf.mxu0  ;;  %v198_v25 = vpop.f32.mrf.mxu1 }
  0xa9   :  { %1591 = vmatmul.msk.f32.gmra.mxu2 %vm212_vm1, %v198_v25  ;;  %1598 = vmatmul.msk.f32.gmra.mxu3 %vm212_vm1, %v130_v24  ;;  %v445_v24 = vld [vmem:[%s2777_s5] sm:$0xff]  ;;  %v1621_v25 = vld [vmem:[%s2777_s5 + $0x38] sm:$0xff] }
  0xaa   :  { %482 = vmatpush.msrb.mxu0 %v445_v24  ;;  %522 = vmatpush.msrb.mxu1 %v1621_v25 }
  0xac   :  { %1633 = vmatpush.msk.msra.mxu0 %vm366_vm2, %v1981_v0 }
  0xae   :  { %562 = vmatpush.msra.mxu0 %v1989_v4 }
  0xb0   :  { %v133_v26 = vpop.f32.mrf.mxu0  ;;  %v201_v27 = vpop.f32.mrf.mxu1  ;;  %563 = vmatpush.msra.mxu0 %v449_v7 }
  0xb1   :  { %1592 = vmatmul.msk.f32.gmra.mxu2 %vm212_vm1, %v201_v27  ;;  %1599 = vmatmul.msk.f32.gmra.mxu3 %vm212_vm1, %v133_v26 }
  0xb2   :  { %564 = vmatpush.msra.mxu0 %v448_v12 }
  0xb4   :  { %565 = vmatpush.msra.mxu0 %v447_v13 }
  0xb6   :  { %566 = vmatpush.msra.mxu0 %v446_v15 }
  0xb8   :  { %v136_v28 = vpop.f32.mrf.mxu0  ;;  %v204_v29 = vpop.f32.mrf.mxu1  ;;  %567 = vmatpush.msra.mxu0 %v445_v24 }
  0xb9   :  { %1593 = vmatmul.msk.f32.gmra.mxu2 %vm212_vm1, %v204_v29  ;;  %1600 = vmatmul.msk.f32.gmra.mxu3 %vm212_vm1, %v136_v28 }
  0xc0   :  { %v139_v30 = vpop.f32.mrf.mxu0  ;;  %v207_v31 = vpop.f32.mrf.mxu1 }
  0xc1   :  { %1594 = vmatmul.msk.f32.gmra.mxu2 %vm212_vm1, %v207_v31  ;;  %1601 = vmatmul.msk.f32.gmra.mxu3 %vm212_vm1, %v139_v30 }
 0x114   :  { %v251_v32 = vpop.f32.mrf.mxu2  ;;  %v310_v33 = vpop.f32.mrf.mxu3 }
 0x115   :  { %v311_v59 = vadd.f32 %v310_v33, %v251_v32 }
 0x117   :  { %v335_v2 = vadd.f32 %v1744_v49, %v311_v59 }
 0x119   :  { %v342_v8 = vmax.f32 %v335_v2, 0.0  ;;  %v1658_v2 = vld [vmem:[%s2779_s7 + $0x60] sm:$0xff] }
 0x11c   :  { %v254_v34 = vpop.f32.mrf.mxu2  ;;  %v313_v35 = vpop.f32.mrf.mxu3 }
 0x11d   :  { %v314_v56 = vadd.f32 %v313_v35, %v254_v34 }
 0x11f   :  { %v336_v63 = vadd.f32 %v1744_v49, %v314_v56 }
 0x121   :  { %v343_v5 = vmax.f32 %v336_v63, 0.0  ;;  %v618_v63 = vld [vmem:[%s2778_s6] sm:$0xff] }
 0x124   :  { %v257_v36 = vpop.f32.mrf.mxu2  ;;  %v316_v37 = vpop.f32.mrf.mxu3 }
 0x125   :  { %v317_v53 = vadd.f32 %v316_v37, %v257_v36 }
 0x127   :  { %v337_v61 = vadd.f32 %v1744_v49, %v317_v53 }
 0x129   :  { %v344_v1 = vmax.f32 %v337_v61, 0.0 }
 0x12c   :  { %v260_v38 = vpop.f32.mrf.mxu2  ;;  %v319_v39 = vpop.f32.mrf.mxu3 }
 0x12d   :  { %v320_v50 = vadd.f32 %v319_v39, %v260_v38 }
 0x12f   :  { %v338_v58 = vadd.f32 %v1744_v49, %v320_v50 }
 0x131   :  { %v345_v62 = vmax.f32 %v338_v58, 0.0 }
 0x134   :  { %v263_v40 = vpop.f32.mrf.mxu2  ;;  %v322_v41 = vpop.f32.mrf.mxu3 }
 0x135   :  { %v323_v47 = vadd.f32 %v322_v41, %v263_v40 }
 0x137   :  { %v339_v55 = vadd.f32 %v1744_v49, %v323_v47 }
 0x139   :  { %v346_v60 = vmax.f32 %v339_v55, 0.0 }
 0x13c   :  { %v266_v42 = vpop.f32.mrf.mxu2  ;;  %v325_v43 = vpop.f32.mrf.mxu3 }
 0x13d   :  { %v326_v44 = vadd.f32 %v325_v43, %v266_v42 }
 0x13f   :  { %v340_v52 = vadd.f32 %v1744_v49, %v326_v44 }
 0x141   :  { %v347_v57 = vmax.f32 %v340_v52, 0.0 }
 0x144   :  { %v269_v45 = vpop.f32.mrf.mxu2  ;;  %v328_v46 = vpop.f32.mrf.mxu3 }
 0x145   :  { %v329_v48 = vadd.f32 %v328_v46, %v269_v45  ;;  %v667_v46 = vld [vmem:[%s2779_s7 + $0x30] sm:$0x3] }
 0x147   :  { %v341_v51 = vadd.f32 %v1744_v49, %v329_v48 }
 0x149   :  { %v348_v54 = vmax.f32 %v341_v51, 0.0 }
 0x14b   :  { %1602 = vmatpush.msk.msrb.mxu2 %vm366_vm2, %v348_v54  ;;  %1611 = vmatpush.msk.msrb.mxu3 %vm366_vm2, %v348_v54 }
 0x14d   :  { %380 = vmatpush.msrb.mxu2 %v347_v57  ;;  %426 = vmatpush.msrb.mxu3 %v347_v57 }
 0x14f   :  { %381 = vmatpush.msrb.mxu2 %v346_v60  ;;  %427 = vmatpush.msrb.mxu3 %v346_v60 }
 0x151   :  { %382 = vmatpush.msrb.mxu2 %v345_v62  ;;  %428 = vmatpush.msrb.mxu3 %v345_v62 }
 0x153   :  { %383 = vmatpush.msrb.mxu2 %v344_v1  ;;  %429 = vmatpush.msrb.mxu3 %v344_v1  ;;  %v1660_v1 = vld [vmem:[%s2779_s7 + $0x70] sm:$0x3] }
 0x155   :  { %384 = vmatpush.msrb.mxu2 %v343_v5  ;;  %430 = vmatpush.msrb.mxu3 %v343_v5  ;;  %v1648_v5 = vld [vmem:[%s2778_s6 + $0x20] sm:$0xff] }
 0x157   :  { %385 = vmatpush.msrb.mxu2 %v342_v8  ;;  %431 = vmatpush.msrb.mxu3 %v342_v8  ;;  %v1661_v8 = vld [vmem:[%s2779_s7 + $0x78] sm:$0x3] }
 0x158   :  { %1603 = vmatmul.msk.f32.vlgmr.msrb.gmra.mxu2 %vm353_vm3, %v349_v9  ;;  %1612 = vmatmul.msk.f32.vlgmr.msrb.gmra.mxu3 %vm353_vm3, %v1607_v10  ;;  %v665_v9 = vld [vmem:[%s2779_s7 + $0x20] sm:$0xff]  ;;  %v1659_v10 = vld [vmem:[%s2779_s7 + $0x68] sm:$0xff] }
 0x159   :  { %1638 = vmatpush.msk.msra.mxu3 %vm366_vm2, %v1627_v3  ;;  %1729 = vmatpush.msk.msra.mxu2 %vm366_vm2, %v1981_v0  ;;  %v1647_v0 = vld [vmem:[%s2778_s6 + $0x18] sm:$0xff]  ;;  %v1656_v3 = vld [vmem:[%s2779_s7 + $0x50] sm:$0xff] }
 0x15b   :  { %591 = vmatpush.msra.mxu3 %v1626_v6  ;;  %1730 = vmatpush.msra.mxu2 %v1989_v4  ;;  %v619_v4 = vld [vmem:[%s2778_s6 + $0x8] sm:$0xff]  ;;  %v620_v6 = vld [vmem:[%s2778_s6 + $0x10] sm:$0xff] }
 0x15d   :  { %592 = vmatpush.msra.mxu3 %v1625_v11  ;;  %1731 = vmatpush.msra.mxu2 %v449_v7  ;;  %v1649_v7 = vld [vmem:[%s2778_s6 + $0x28] sm:$0xff]  ;;  %v663_v11 = vld [vmem:[%s2779_s7 + $0x10] sm:$0xff] }
 0x15f   :  { %593 = vmatpush.msra.mxu3 %v1624_v14  ;;  %1732 = vmatpush.msra.mxu2 %v448_v12  ;;  %v1654_v12 = vld [vmem:[%s2779_s7 + $0x40] sm:$0xff] }
 0x160   :  { %1604 = vmatmul.msk.f32.gmra.mxu2 %vm353_vm3, %v350_v17  ;;  %1613 = vmatmul.msk.f32.gmra.mxu3 %vm353_vm3, %v1608_v18  ;;  %v661_v14 = vld [vmem:[%s2779_s7] sm:$0xff]  ;;  %v1655_v17 = vld [vmem:[%s2779_s7 + $0x48] sm:$0xff]  ;;  %v664_v18 = vld [vmem:[%s2779_s7 + $0x18] sm:$0xff] }
 0x161   :  { %594 = vmatpush.msra.mxu3 %v1623_v16  ;;  %1733 = vmatpush.msra.mxu2 %v447_v13  ;;  %v1657_v13 = vld [vmem:[%s2779_s7 + $0x58] sm:$0xff]  ;;  %v666_v16 = vld [vmem:[%s2779_s7 + $0x28] sm:$0xff] }
 0x163   :  { %595 = vmatpush.msra.mxu3 %v1622_v19  ;;  %1734 = vmatpush.msra.mxu2 %v446_v15  ;;  %v668_v15 = vld [vmem:[%s2779_s7 + $0x38] sm:$0x3]  ;;  %v662_v19 = vld [vmem:[%s2779_s7 + $0x8] sm:$0xff] }
 0x165   :  { %596 = vmatpush.msra.mxu3 %v1621_v25  ;;  %1735 = vmatpush.msra.mxu2 %v445_v24 }
 0x167   :  { %1670 = vmatpush.msk.msrb.mxu2 %vm631_vm4, %v667_v46  ;;  %1736 = vmatpush.msk.msrb.mxu3 %vm631_vm4, %v668_v15 }
 0x168   :  { %1605 = vmatmul.msk.f32.gmra.mxu2 %vm353_vm3, %v351_v20  ;;  %1614 = vmatmul.msk.f32.gmra.mxu3 %vm353_vm3, %v1609_v21 }
 0x169   :  { %812 = vmatpush.msrb.mxu2 %v665_v9  ;;  %1737 = vmatpush.msrb.mxu3 %v666_v16  ;;  %v870_v9 = vld [vmem:[%s2781_s9 + $0x8] sm:$0xf] }
 0x16b   :  { %813 = vmatpush.msrb.mxu2 %v663_v11  ;;  %1738 = vmatpush.msrb.mxu3 %v664_v18  ;;  %v2266_v11 = vld [vmem:[%s2782_s10 + $0x60] sm:$0xff] }
 0x16d   :  { %814 = vmatpush.msrb.mxu2 %v661_v14  ;;  %1739 = vmatpush.msrb.mxu3 %v662_v19  ;;  %v2285_v14 = vld [vmem:[%s2782_s10 + $0x160] sm:$0xff] }
 0x170   :  { %1606 = vmatmul.msk.f32.gmra.mxu2 %vm353_vm3, %v352_v22  ;;  %1615 = vmatmul.msk.f32.gmra.mxu3 %vm353_vm3, %v1610_v23 }
 0x1db   :  { %v387_v26 = vpop.f32.mrf.mxu2  ;;  %v433_v27 = vpop.f32.mrf.mxu3 }
 0x1dc   :  { %1617 = vmatmul.msk.f32.vlgmr.msrb.gmra.mxu0 %vm353_vm3, %v387_v26  ;;  %1639 = vmatmul.msk.f32.vlgmr.msra.gmra.mxu3 %vm353_vm3, %v433_v27 }
 0x1dd   :  { %1629 = vmatmul.msk.f32.vlgmr.msrb.gmra.mxu1 %vm353_vm3, %v387_v26 }
 0x1e3   :  { %v390_v28 = vpop.f32.mrf.mxu2  ;;  %v436_v29 = vpop.f32.mrf.mxu3 }
 0x1e4   :  { %1618 = vmatmul.msk.f32.gmra.mxu0 %vm353_vm3, %v390_v28  ;;  %1635 = vmatmul.msk.f32.vlgmr.msra.gmra.mxu2 %vm353_vm3, %v436_v29 }
 0x1e5   :  { %1640 = vmatmul.msk.f32.gmra.mxu3 %vm353_vm3, %v436_v29  ;;  %1630 = vmatmul.msk.f32.gmra.mxu1 %vm353_vm3, %v390_v28 }
 0x1eb   :  { %v393_v30 = vpop.f32.mrf.mxu2  ;;  %v439_v31 = vpop.f32.mrf.mxu3 }
 0x1ec   :  { %1619 = vmatmul.msk.f32.gmra.mxu0 %vm353_vm3, %v393_v30  ;;  %1636 = vmatmul.msk.f32.gmra.mxu2 %vm353_vm3, %v439_v31 }
 0x1ed   :  { %1641 = vmatmul.msk.f32.gmra.mxu3 %vm353_vm3, %v439_v31  ;;  %1631 = vmatmul.msk.f32.gmra.mxu1 %vm353_vm3, %v393_v30 }
 0x1f3   :  { %v396_v32 = vpop.f32.mrf.mxu2  ;;  %v442_v33 = vpop.f32.mrf.mxu3 }
 0x1f4   :  { %1620 = vmatmul.msk.f32.gmra.mxu0 %vm353_vm3, %v396_v32  ;;  %1637 = vmatmul.msk.f32.gmra.mxu2 %vm353_vm3, %v442_v33 }
 0x1f5   :  { %1642 = vmatmul.msk.f32.gmra.mxu3 %vm353_vm3, %v442_v33  ;;  %1632 = vmatmul.msk.f32.gmra.mxu1 %vm353_vm3, %v396_v32 }
 0x1fc   :  { %1634 = vmatmul.msk.f32.vlgmr.msra.gmra.mxu0 %vm353_vm3, %v433_v27 }
 0x259   :  { %v484_v34 = vpop.f32.mrf.mxu0 }
 0x25a   :  { %v524_v35 = vpop.f32.mrf.mxu1 }
 0x25b   :  { %v536_v60 = vmax.f32 %v484_v34, %v524_v35  ;;  %v851_v34 = vld [vmem:[%s2780_s8] sm:$0x3] }
 0x25f   :  { %v598_v36 = vpop.f32.mrf.mxu3 }
 0x261   :  { %v487_v37 = vpop.f32.mrf.mxu0 }
 0x262   :  { %v527_v38 = vpop.f32.mrf.mxu1 }
 0x263   :  { %v537_v57 = vmax.f32 %v487_v37, %v527_v38 }
 0x267   :  { %v572_v39 = vpop.f32.mrf.mxu2 }
 0x268   :  { %v601_v40 = vpop.f32.mrf.mxu3 }
 0x269   :  { %v490_v41 = vpop.f32.mrf.mxu0  ;;  %v611_v54 = vmax.f32 %v572_v39, %v601_v40 }
 0x26a   :  { %v530_v42 = vpop.f32.mrf.mxu1 }
 0x26b   :  { %v538_v55 = vmax.f32 %v490_v41, %v530_v42  ;;  %v615_v61 = vmax.f32 %v537_v57, %v611_v54 }
 0x26f   :  { %v575_v43 = vpop.f32.mrf.mxu2 }
 0x270   :  { %v604_v44 = vpop.f32.mrf.mxu3 }
 0x271   :  { %v493_v45 = vpop.f32.mrf.mxu0  ;;  %v612_v50 = vmax.f32 %v575_v43, %v604_v44  ;;  %v853_v43 = vperm.slane %v851_v34, 0 }
 0x272   :  { %v533_v47 = vpop.f32.mrf.mxu1 }
 0x273   :  { %v539_v51 = vmax.f32 %v493_v45, %v533_v47  ;;  %v616_v58 = vmax.f32 %v538_v55, %v612_v50 }
 0x277   :  { %v578_v48 = vpop.f32.mrf.mxu2 }
 0x278   :  { %v607_v49 = vpop.f32.mrf.mxu3 }
 0x279   :  { %v613_v52 = vmax.f32 %v578_v48, %v607_v49  ;;  %v569_v53 = vpop.f32.mrf.mxu0 }
 0x27a   :  { %v610_v59 = vmax.f32 %v569_v53, %v598_v36  ;;  %v854_v36 = vperm.slane %v851_v34, 1  ;;  %v984_v34 = vld [vmem:[%s2782_s10 + $0x28] sm:$0xff] }
 0x27b   :  { %v617_v56 = vmax.f32 %v539_v51, %v613_v52 }
 0x27c   :  { %v614_v62 = vmax.f32 %v536_v60, %v610_v59  ;;  %v869_v59 = vld [vmem:[%s2781_s9] sm:$0xff]  ;;  %v1682_v60 = vld [vmem:[%s2781_s9 + $0x10] sm:$0xff] }
 0x27d   :  { %1643 = vmatpush.msk.msrb.mxu0 %vm631_vm4, %v617_v56  ;;  %1650 = vmatpush.msk.msra.mxu1 %vm631_vm4, %v617_v56 }
 0x27f   :  { %648 = vmatpush.msrb.mxu0 %v616_v58  ;;  %695 = vmatpush.msra.mxu1 %v616_v58 }
 0x281   :  { %649 = vmatpush.msrb.mxu0 %v615_v61  ;;  %696 = vmatpush.msra.mxu1 %v615_v61  ;;  %v2186_v61 = vld [vmem:[%s2782_s10 + $0x78] sm:$0xff] }
 0x283   :  { %650 = vmatpush.msrb.mxu0 %v614_v62  ;;  %697 = vmatpush.msra.mxu1 %v614_v62  ;;  %v2191_v62 = vld [vmem:[%s2782_s10 + $0x138] sm:$0xff] }
 0x284   :  { %1644 = vmatmul.msk.f32.vlgmr.msrb.gmra.mxu0 %vm621_vm5, %v618_v63  ;;  %1651 = vmatmul.msk.f32.vlgmr.msra.gmra.mxu1 %vm621_vm5, %v1647_v0  ;;  %v2198_v63 = vld [vmem:[%s2782_s10 + $0xb8] sm:$0xff] }
 0x285   :  { %1662 = vmatpush.msk.msra.mxu0 %vm631_vm4, %v1660_v1  ;;  %1666 = vmatpush.msk.msrb.mxu1 %vm631_vm4, %v1661_v8  ;;  %v2203_v0 = vld [vmem:[%s2782_s10 + $0x178] sm:$0xff]  ;;  %v2210_v1 = vld [vmem:[%s2782_s10 + $0x70] sm:$0xff]  ;;  %v2251_v8 = vld [vmem:[%s2782_s10 + $0x168] sm:$0xff] }
 0x287   :  { %745 = vmatpush.msra.mxu0 %v1658_v2  ;;  %771 = vmatpush.msrb.mxu1 %v1659_v10  ;;  %v2215_v2 = vld [vmem:[%s2782_s10 + $0x130] sm:$0xff]  ;;  %v1683_v10 = vld [vmem:[%s2781_s9 + $0x18] sm:$0xf] }
 0x289   :  { %746 = vmatpush.msra.mxu0 %v1656_v3  ;;  %772 = vmatpush.msrb.mxu1 %v1657_v13  ;;  %v2222_v3 = vld [vmem:[%s2782_s10 + $0xb0] sm:$0xff]  ;;  %v2280_v13 = vld [vmem:[%s2782_s10 + $0xa0] sm:$0xff] }
 0x28b   :  { %747 = vmatpush.msra.mxu0 %v1654_v12  ;;  %773 = vmatpush.msrb.mxu1 %v1655_v17  ;;  %v2271_v12 = vld [vmem:[%s2782_s10 + $0x120] sm:$0xff]  ;;  %v2302_v17 = vld [vmem:[%s2782_s10 + $0x98] sm:$0xff] }
 0x28c   :  { %1645 = vmatmul.msk.f32.gmra.mxu0 %vm621_vm5, %v619_v4  ;;  %1652 = vmatmul.msk.f32.gmra.mxu1 %vm621_vm5, %v1648_v5  ;;  %v2227_v4 = vld [vmem:[%s2782_s10 + $0x170] sm:$0xff]  ;;  %v2232_v5 = vld [vmem:[%s2782_s10 + $0x68] sm:$0xff] }
 0x28d   :  { %1674 = vmatpush.msk.msrb.mxu0 %vm631_vm4, %v668_v15  ;;  %v990_v15 = vld [vmem:[%s2782_s10 + $0x58] sm:$0xff] }
 0x28f   :  { %838 = vmatpush.msrb.mxu0 %v666_v16  ;;  %v2295_v16 = vld [vmem:[%s2782_s10 + $0x118] sm:$0xff] }
 0x291   :  { %839 = vmatpush.msrb.mxu0 %v664_v18  ;;  %v2307_v18 = vld [vmem:[%s2782_s10 + $0x158] sm:$0xff] }
 0x293   :  { %840 = vmatpush.msrb.mxu0 %v662_v19  ;;  %v989_v19 = vld [vmem:[%s2782_s10 + $0x50] sm:$0xff] }
 0x294   :  { %1646 = vmatmul.msk.f32.gmra.mxu0 %vm621_vm5, %v620_v6  ;;  %1653 = vmatmul.msk.f32.gmra.mxu1 %vm621_vm5, %v1649_v7  ;;  %v2237_v6 = vld [vmem:[%s2782_s10 + $0x128] sm:$0xff] }
 0x295   :  { %v2246_v7 = vld [vmem:[%s2782_s10 + $0xa8] sm:$0xff] }
 0x301   :  { %v652_v20 = vpop.f32.mrf.mxu0  ;;  %v699_v21 = vpop.f32.mrf.mxu1 }
 0x302   :  { %1663 = vmatmul.msk.f32.vlgmr.msra.gmra.mxu0 %vm621_vm5, %v699_v21  ;;  %1671 = vmatmul.msk.f32.vlgmr.msrb.gmra.mxu2 %vm621_vm5, %v652_v20 }
 0x303   :  { %1667 = vmatmul.msk.f32.vlgmr.msrb.gmra.mxu1 %vm621_vm5, %v699_v21  ;;  %v2323_v21 = vld [vmem:[%s2782_s10 + $0x90] sm:$0xff] }
 0x309   :  { %v655_v22 = vpop.f32.mrf.mxu0  ;;  %v702_v23 = vpop.f32.mrf.mxu1 }
 0x30a   :  { %1664 = vmatmul.msk.f32.gmra.mxu0 %vm621_vm5, %v702_v23  ;;  %1676 = vmatmul.msk.f32.vlgmr.msrb.gmra.mxu3 %vm621_vm5, %v655_v22 }
 0x30b   :  { %1672 = vmatmul.msk.f32.gmra.mxu2 %vm621_vm5, %v655_v22  ;;  %1668 = vmatmul.msk.f32.gmra.mxu1 %vm621_vm5, %v702_v23  ;;  %v2328_v22 = vld [vmem:[%s2782_s10 + $0x150] sm:$0xff]  ;;  %v988_v23 = vld [vmem:[%s2782_s10 + $0x48] sm:$0xff] }
 0x311   :  { %v658_v24 = vpop.f32.mrf.mxu0  ;;  %v705_v25 = vpop.f32.mrf.mxu1 }
 0x312   :  { %1665 = vmatmul.msk.f32.gmra.mxu0 %vm621_vm5, %v705_v25  ;;  %1677 = vmatmul.msk.f32.gmra.mxu3 %vm621_vm5, %v658_v24 }
 0x313   :  { %1673 = vmatmul.msk.f32.gmra.mxu2 %vm621_vm5, %v658_v24  ;;  %1669 = vmatmul.msk.f32.gmra.mxu1 %vm621_vm5, %v705_v25  ;;  %v2336_v24 = vld [vmem:[%s2782_s10 + $0x108] sm:$0xff] }
 0x314   :  { %v2344_v25 = vld [vmem:[%s2782_s10 + $0x88] sm:$0xff] }
 0x31a   :  { %1675 = vmatmul.msk.f32.vlgmr.msrb.gmra.mxu0 %vm621_vm5, %v652_v20  ;;  %v2315_v20 = vld [vmem:[%s2782_s10 + $0x110] sm:$0xff] }
 0x37f   :  { %v749_v26 = vpop.f32.mrf.mxu0 }
 0x380   :  { %v775_v27 = vpop.f32.mrf.mxu1 }
 0x385   :  { %v816_v28 = vpop.f32.mrf.mxu2 }
 0x386   :  { %v817_v42 = vadd.f32 %v816_v28, %v749_v26  ;;  %v2349_v26 = vld [vmem:[%s2782_s10 + $0x148] sm:$0xff]  ;;  %v1698_v28 = vld [vmem:[%s2782_s10 + $0x100] sm:$0xff] }
 0x387   :  { %v752_v29 = vpop.f32.mrf.mxu0 }
 0x388   :  { %v778_v30 = vpop.f32.mrf.mxu1  ;;  %v857_v53 = vadd.f32 %v853_v43, %v817_v42  ;;  %v980_v42 = vld [vmem:[%s2782_s10 + $0x8] sm:$0xff] }
 0x38a   :  { %v863_v58 = vmax.f32 %v857_v53, 0.0 }
 0x38d   :  { %v845_v31 = vpop.f32.mrf.mxu3 }
 0x38e   :  { %v819_v32 = vpop.f32.mrf.mxu2  ;;  %v846_v35 = vadd.f32 %v845_v31, %v778_v30  ;;  %v986_v30 = vld [vmem:[%s2782_s10 + $0x38] sm:$0xff] }
 0x38f   :  { %v755_v33 = vpop.f32.mrf.mxu0  ;;  %v820_v37 = vadd.f32 %v819_v32, %v752_v29  ;;  %v2363_v29 = vld [vmem:[%s2782_s10 + $0x80] sm:$0xff]  ;;  %v1697_v31 = vld [vmem:[%s2782_s10 + $0xf8] sm:$0xff]  ;;  %v985_v32 = vld [vmem:[%s2782_s10 + $0x30] sm:$0xff] }
 0x390   :  { %v781_v38 = vpop.f32.mrf.mxu1  ;;  %v860_v46 = vadd.f32 %v854_v36, %v846_v35  ;;  %v1695_v35 = vld [vmem:[%s2782_s10 + $0xe8] sm:$0xff] }
 0x391   :  { %v859_v49 = vadd.f32 %v853_v43, %v820_v37  ;;  %v1694_v37 = vld [vmem:[%s2782_s10 + $0xe0] sm:$0xff] }
 0x392   :  { %v866_v55 = vmax.f32 %v860_v46, 0.0  ;;  %v1706_v46 = vld [vmem:[%s2782_s10 + $0x140] sm:$0xff] }
 0x393   :  { %v865_v56 = vmax.f32 %v859_v49, 0.0  ;;  %v1260_v49 = vld [vmem:[%s2783_s11 + $0xb8] sm:$0xff] }
 0x395   :  { %v848_v39 = vpop.f32.mrf.mxu3 }
 0x396   :  { %v849_v40 = vadd.f32 %v848_v39, %v781_v38  ;;  %v822_v41 = vpop.f32.mrf.mxu2  ;;  %v982_v38 = vld [vmem:[%s2782_s10 + $0x18] sm:$0xff] }
 0x397   :  { %v842_v44 = vpop.f32.mrf.mxu0  ;;  %v823_v45 = vadd.f32 %v822_v41, %v755_v33  ;;  %v1696_v33 = vld [vmem:[%s2782_s10 + $0xf0] sm:$0xff]  ;;  %v1693_v39 = vld [vmem:[%s2782_s10 + $0xd8] sm:$0xff] }
 0x398   :  { %v862_v47 = vadd.f32 %v854_v36, %v849_v40  ;;  %v843_v48 = vadd.f32 %v842_v44, %v775_v27  ;;  %v987_v27 = vld [vmem:[%s2782_s10 + $0x40] sm:$0xff]  ;;  %v981_v40 = vld [vmem:[%s2782_s10 + $0x10] sm:$0xff] }
 0x399   :  { %v861_v50 = vadd.f32 %v853_v43, %v823_v45  ;;  %v1692_v41 = vld [vmem:[%s2782_s10 + $0xd0] sm:$0xff]  ;;  %v1691_v43 = vld [vmem:[%s2782_s10 + $0xc8] sm:$0xff]  ;;  %v979_v44 = vld [vmem:[%s2782_s10] sm:$0xff] }
 0x39a   :  { %v868_v51 = vmax.f32 %v862_v47, 0.0  ;;  %v858_v52 = vadd.f32 %v854_v36, %v843_v48  ;;  %v983_v36 = vld [vmem:[%s2782_s10 + $0x20] sm:$0xff] }
 0x39b   :  { %v867_v54 = vmax.f32 %v861_v50, 0.0  ;;  %v1690_v45 = vld [vmem:[%s2782_s10 + $0xc0] sm:$0xff]  ;;  %v1259_v50 = vld [vmem:[%s2783_s11 + $0xb0] sm:$0xff] }
 0x39c   :  { %914 = vmatpush.msra.mxu1 %v868_v51  ;;  %969 = vmatpush.msra.mxu3 %v868_v51  ;;  %v864_v57 = vmax.f32 %v858_v52, 0.0  ;;  %v1258_v51 = vld [vmem:[%s2783_s11 + $0xa8] sm:$0xff] }
 0x39d   :  { %891 = vmatpush.msra.mxu0 %v867_v54  ;;  %946 = vmatpush.msra.mxu2 %v867_v54  ;;  %v1257_v54 = vld [vmem:[%s2783_s11 + $0xa0] sm:$0xff] }
 0x39e   :  { %915 = vmatpush.msra.mxu1 %v866_v55  ;;  %970 = vmatpush.msra.mxu3 %v866_v55 }
 0x39f   :  { %892 = vmatpush.msra.mxu0 %v865_v56  ;;  %947 = vmatpush.msra.mxu2 %v865_v56 }
 0x3a0   :  { %916 = vmatpush.msra.mxu1 %v864_v57  ;;  %971 = vmatpush.msra.mxu3 %v864_v57 }
 0x3a1   :  { %893 = vmatpush.msra.mxu0 %v863_v58  ;;  %948 = vmatpush.msra.mxu2 %v863_v58 }
 0x3a2   :  { %1678 = vmatmul.msk.f32.vlgmr.msra.gmra.mxu0 %vm871_vm6, %v869_v59  ;;  %1680 = vmatmul.msk.f32.vlgmr.msra.gmra.mxu1 %vm871_vm6, %v869_v59  ;;  %v1247_v59 = vld [vmem:[%s2783_s11 + $0x58] sm:$0xff] }
 0x3a3   :  { %1686 = vmatmul.msk.f32.vlgmr.msra.gmra.mxu3 %vm871_vm6, %v1682_v60  ;;  %1684 = vmatmul.msk.f32.vlgmr.msra.gmra.mxu2 %vm871_vm6, %v1682_v60  ;;  %v1246_v60 = vld [vmem:[%s2783_s11 + $0x50] sm:$0xff] }
 0x3a4   :  { %1010 = vmatpush.msrb.mxu0 %v2186_v61  ;;  %1081 = vmatpush.msrb.mxu2 %v2191_v62 }
 0x3a5   :  { %1041 = vmatpush.msrb.mxu1 %v2198_v63  ;;  %1112 = vmatpush.msrb.mxu3 %v2203_v0 }
 0x3a6   :  { %1011 = vmatpush.msrb.mxu0 %v2210_v1  ;;  %1082 = vmatpush.msrb.mxu2 %v2215_v2 }
 0x3a7   :  { %1042 = vmatpush.msrb.mxu1 %v2222_v3  ;;  %1113 = vmatpush.msrb.mxu3 %v2227_v4 }
 0x3a8   :  { %1012 = vmatpush.msrb.mxu0 %v2232_v5  ;;  %1083 = vmatpush.msrb.mxu2 %v2237_v6 }
 0x3a9   :  { %1043 = vmatpush.msrb.mxu1 %v2246_v7  ;;  %1114 = vmatpush.msrb.mxu3 %v2251_v8 }
 0x3aa   :  { %1679 = vmatmul.msk.f32.gmra.mxu0 %vm871_vm6, %v870_v9  ;;  %1681 = vmatmul.msk.f32.gmra.mxu1 %vm871_vm6, %v870_v9  ;;  %v1239_v9 = vld [vmem:[%s2783_s11 + $0x18] sm:$0xff] }
 0x3ab   :  { %1687 = vmatmul.msk.f32.gmra.mxu3 %vm871_vm6, %v1683_v10  ;;  %1685 = vmatmul.msk.f32.gmra.mxu2 %vm871_vm6, %v1683_v10  ;;  %v1318_v10 = vld [vmem:[%s2783_s11 + $0x110] sm:$0xff] }
 0x3ac   :  { %1013 = vmatpush.msrb.mxu0 %v2266_v11  ;;  %1084 = vmatpush.msrb.mxu2 %v2271_v12 }
 0x3ad   :  { %1044 = vmatpush.msrb.mxu1 %v2280_v13  ;;  %1115 = vmatpush.msrb.mxu3 %v2285_v14 }
 0x3ae   :  { %1014 = vmatpush.msrb.mxu0 %v990_v15  ;;  %1085 = vmatpush.msrb.mxu2 %v2295_v16 }
 0x3af   :  { %1045 = vmatpush.msrb.mxu1 %v2302_v17  ;;  %1116 = vmatpush.msrb.mxu3 %v2307_v18 }
 0x3b0   :  { %1015 = vmatpush.msrb.mxu0 %v989_v19  ;;  %1086 = vmatpush.msrb.mxu2 %v2315_v20 }
 0x3b1   :  { %1046 = vmatpush.msrb.mxu1 %v2323_v21  ;;  %1117 = vmatpush.msrb.mxu3 %v2328_v22 }
 0x3b2   :  { %1016 = vmatpush.msrb.mxu0 %v988_v23  ;;  %1087 = vmatpush.msrb.mxu2 %v2336_v24 }
 0x3b3   :  { %1047 = vmatpush.msrb.mxu1 %v2344_v25  ;;  %1118 = vmatpush.msrb.mxu3 %v2349_v26 }
 0x3b4   :  { %1017 = vmatpush.msrb.mxu0 %v987_v27  ;;  %1088 = vmatpush.msrb.mxu2 %v1698_v28 }
 0x3b5   :  { %1048 = vmatpush.msrb.mxu1 %v2363_v29  ;;  %1119 = vmatpush.msrb.mxu3 %v1706_v46 }
 0x3b6   :  { %1018 = vmatpush.msrb.mxu0 %v986_v30  ;;  %1089 = vmatpush.msrb.mxu2 %v1697_v31 }
 0x3b7   :  { %1135 = vmatpush.msra.mxu1 %v2186_v61  ;;  %1166 = vmatpush.msra.mxu3 %v2198_v63  ;;  %v1245_v61 = vld [vmem:[%s2783_s11 + $0x48] sm:$0xff]  ;;  %v1256_v63 = vld [vmem:[%s2783_s11 + $0x98] sm:$0xff] }
 0x3b8   :  { %1019 = vmatpush.msrb.mxu0 %v985_v32  ;;  %1090 = vmatpush.msrb.mxu2 %v1696_v33 }
 0x3b9   :  { %1136 = vmatpush.msra.mxu1 %v2210_v1  ;;  %1167 = vmatpush.msra.mxu3 %v2222_v3  ;;  %v1255_v1 = vld [vmem:[%s2783_s11 + $0x90] sm:$0xff] }
 0x3ba   :  { %1020 = vmatpush.msrb.mxu0 %v984_v34  ;;  %1091 = vmatpush.msrb.mxu2 %v1695_v35  ;;  %v1242_v3 = vld [vmem:[%s2783_s11 + $0x30] sm:$0xff] }
 0x3bb   :  { %1137 = vmatpush.msra.mxu1 %v2232_v5  ;;  %1168 = vmatpush.msra.mxu3 %v2246_v7  ;;  %v1241_v5 = vld [vmem:[%s2783_s11 + $0x28] sm:$0xff]  ;;  %v1319_v7 = vld [vmem:[%s2783_s11 + $0x118] sm:$0xff] }
 0x3bc   :  { %1021 = vmatpush.msrb.mxu0 %v983_v36  ;;  %1092 = vmatpush.msrb.mxu2 %v1694_v37 }
 0x3bd   :  { %1138 = vmatpush.msra.mxu1 %v2266_v11  ;;  %1169 = vmatpush.msra.mxu3 %v2280_v13  ;;  %v1251_v11 = vld [vmem:[%s2783_s11 + $0x70] sm:$0xff]  ;;  %v1317_v13 = vld [vmem:[%s2783_s11 + $0x108] sm:$0xff] }
 0x3be   :  { %1022 = vmatpush.msrb.mxu0 %v982_v38  ;;  %1093 = vmatpush.msrb.mxu2 %v1693_v39 }
 0x3bf   :  { %1139 = vmatpush.msra.mxu1 %v990_v15  ;;  %1170 = vmatpush.msra.mxu3 %v2302_v17  ;;  %v1249_v15 = vld [vmem:[%s2783_s11 + $0x60] sm:$0xff] }
 0x3c0   :  { %1023 = vmatpush.msrb.mxu0 %v981_v40  ;;  %1094 = vmatpush.msrb.mxu2 %v1692_v41  ;;  %v1316_v17 = vld [vmem:[%s2783_s11 + $0x100] sm:$0xff] }
 0x3c1   :  { %1140 = vmatpush.msra.mxu1 %v989_v19  ;;  %1171 = vmatpush.msra.mxu3 %v2323_v21  ;;  %v1356_v19 = vld [vmem:[%s2783_s11 + $0x178] sm:$0xff] }
 0x3c2   :  { %1024 = vmatpush.msrb.mxu0 %v980_v42  ;;  %1095 = vmatpush.msrb.mxu2 %v1691_v43  ;;  %v1393_v21 = vld [vmem:[%s2783_s11 + $0x1d8] sm:$0xff] }
 0x3c3   :  { %1141 = vmatpush.msra.mxu1 %v988_v23  ;;  %1172 = vmatpush.msra.mxu3 %v2344_v25  ;;  %v1355_v23 = vld [vmem:[%s2783_s11 + $0x170] sm:$0xff] }
 0x3c4   :  { %1025 = vmatpush.msrb.mxu0 %v979_v44  ;;  %1096 = vmatpush.msrb.mxu2 %v1690_v45  ;;  %v1392_v25 = vld [vmem:[%s2783_s11 + $0x1d0] sm:$0xff] }
 0x3c5   :  { %1142 = vmatpush.msra.mxu1 %v987_v27  ;;  %1173 = vmatpush.msra.mxu3 %v2363_v29  ;;  %v1354_v27 = vld [vmem:[%s2783_s11 + $0x168] sm:$0xff] }
 0x3c6   :  { %1181 = vmatpush.msra.mxu0 %v2191_v62  ;;  %1212 = vmatpush.msra.mxu2 %v2203_v0  ;;  %v1244_v62 = vld [vmem:[%s2783_s11 + $0x40] sm:$0xff]  ;;  %v1243_v0 = vld [vmem:[%s2783_s11 + $0x38] sm:$0xff]  ;;  %v1391_v29 = vld [vmem:[%s2783_s11 + $0x1c8] sm:$0xff] }
 0x3c7   :  { %1143 = vmatpush.msra.mxu1 %v986_v30  ;;  %v1428_v30 = vld [vmem:[%s2783_s11 + $0x228] sm:$0xff] }
 0x3c8   :  { %1182 = vmatpush.msra.mxu0 %v2215_v2  ;;  %1213 = vmatpush.msra.mxu2 %v2227_v4  ;;  %v1254_v2 = vld [vmem:[%s2783_s11 + $0x88] sm:$0xff]  ;;  %v1253_v4 = vld [vmem:[%s2783_s11 + $0x80] sm:$0xff] }
 0x3c9   :  { %1144 = vmatpush.msra.mxu1 %v985_v32  ;;  %v1312_v32 = vld [vmem:[%s2783_s11 + $0xe0] sm:$0xff] }
 0x3ca   :  { %1183 = vmatpush.msra.mxu0 %v2237_v6  ;;  %1214 = vmatpush.msra.mxu2 %v2251_v8  ;;  %v1240_v6 = vld [vmem:[%s2783_s11 + $0x20] sm:$0xff]  ;;  %v1252_v8 = vld [vmem:[%s2783_s11 + $0x78] sm:$0xff] }
 0x3cb   :  { %1145 = vmatpush.msra.mxu1 %v984_v34  ;;  %v1352_v34 = vld [vmem:[%s2783_s11 + $0x158] sm:$0xff] }
 0x3cc   :  { %1184 = vmatpush.msra.mxu0 %v2271_v12  ;;  %1215 = vmatpush.msra.mxu2 %v2285_v14  ;;  %v1250_v12 = vld [vmem:[%s2783_s11 + $0x68] sm:$0xff]  ;;  %v1238_v14 = vld [vmem:[%s2783_s11 + $0x10] sm:$0xff] }
 0x3cd   :  { %1146 = vmatpush.msra.mxu1 %v983_v36  ;;  %v1311_v36 = vld [vmem:[%s2783_s11 + $0xd8] sm:$0xff] }
 0x3ce   :  { %1185 = vmatpush.msra.mxu0 %v2295_v16  ;;  %1216 = vmatpush.msra.mxu2 %v2307_v18  ;;  %v1237_v16 = vld [vmem:[%s2783_s11 + $0x8] sm:$0xff]  ;;  %v1236_v18 = vld [vmem:[%s2783_s11] sm:$0xff] }
 0x3cf   :  { %1147 = vmatpush.msra.mxu1 %v982_v38  ;;  %v1427_v38 = vld [vmem:[%s2783_s11 + $0x220] sm:$0xff] }
 0x3d0   :  { %1186 = vmatpush.msra.mxu0 %v2315_v20  ;;  %1217 = vmatpush.msra.mxu2 %v2328_v22  ;;  %v1315_v20 = vld [vmem:[%s2783_s11 + $0xf8] sm:$0xff] }
 0x3d1   :  { %1148 = vmatpush.msra.mxu1 %v981_v40  ;;  %v1430_v22 = vld [vmem:[%s2783_s11 + $0x238] sm:$0xff]  ;;  %v1350_v40 = vld [vmem:[%s2783_s11 + $0x148] sm:$0xff] }
 0x3d2   :  { %1187 = vmatpush.msra.mxu0 %v2336_v24  ;;  %1218 = vmatpush.msra.mxu2 %v2349_v26  ;;  %v1314_v24 = vld [vmem:[%s2783_s11 + $0xf0] sm:$0xff] }
 0x3d3   :  { %1149 = vmatpush.msra.mxu1 %v980_v42  ;;  %v1429_v26 = vld [vmem:[%s2783_s11 + $0x230] sm:$0xff] }
 0x3d4   :  { %1188 = vmatpush.msra.mxu0 %v1698_v28  ;;  %1219 = vmatpush.msra.mxu2 %v1706_v46  ;;  %v1313_v28 = vld [vmem:[%s2783_s11 + $0xe8] sm:$0xff]  ;;  %v1388_v42 = vld [vmem:[%s2783_s11 + $0x1b0] sm:$0xff]  ;;  %v1349_v46 = vld [vmem:[%s2783_s11 + $0x140] sm:$0xff] }
 0x3d5   :  { %1150 = vmatpush.msra.mxu1 %v979_v44 }
 0x3d6   :  { %1189 = vmatpush.msra.mxu0 %v1697_v31  ;;  %v1353_v31 = vld [vmem:[%s2783_s11 + $0x160] sm:$0xff] }
 0x3d8   :  { %1190 = vmatpush.msra.mxu0 %v1696_v33  ;;  %v1390_v33 = vld [vmem:[%s2783_s11 + $0x1c0] sm:$0xff] }
 0x3da   :  { %1191 = vmatpush.msra.mxu0 %v1695_v35  ;;  %v1351_v35 = vld [vmem:[%s2783_s11 + $0x150] sm:$0xff] }
 0x3dc   :  { %1192 = vmatpush.msra.mxu0 %v1694_v37  ;;  %v1389_v37 = vld [vmem:[%s2783_s11 + $0x1b8] sm:$0xff] }
 0x3de   :  { %1193 = vmatpush.msra.mxu0 %v1693_v39  ;;  %v1426_v39 = vld [vmem:[%s2783_s11 + $0x218] sm:$0xff] }
 0x3e0   :  { %1194 = vmatpush.msra.mxu0 %v1692_v41  ;;  %v1310_v41 = vld [vmem:[%s2783_s11 + $0xd0] sm:$0xff] }
 0x3e2   :  { %1195 = vmatpush.msra.mxu0 %v1691_v43 }
 0x3e4   :  { %1196 = vmatpush.msra.mxu0 %v1690_v45  ;;  %v1425_v45 = vld [vmem:[%s2783_s11 + $0x210] sm:$0xff] }
 0x41f   :  { %v895_v47 = vpop.f32.mrf.mxu0  ;;  %v918_v48 = vpop.f32.mrf.mxu1 }
 0x420   :  { %1097 = vmatmul.f32.vlgmr.msrb.gmra.mxu2 %v895_v47  ;;  %1714 = vmatmul.msk.f32.vlgmr.msrb.gmra.mxu3 %vm1003_vm7, %v918_v48 }
 0x421   :  { %1026 = vmatmul.f32.vlgmr.msrb.gmra.mxu0 %v895_v47  ;;  %1688 = vmatmul.msk.f32.vlgmr.msrb.gmra.mxu1 %vm1003_vm7, %v918_v48  ;;  %v1309_v47 = vld [vmem:[%s2783_s11 + $0xc8] sm:$0xff] }
 0x422   :  { %1268 = vmatpush.msrb.mxu3 %v1260_v49  ;;  %1291 = vmatpush.msrb.mxu1 %v1247_v59  ;;  %v1387_v48 = vld [vmem:[%s2783_s11 + $0x1a8] sm:$0xff] }
 0x423   :  { %1327 = vmatpush.msrb.mxu2 %v1319_v7  ;;  %1401 = vmatpush.msrb.mxu0 %v1393_v21  ;;  %v1424_v49 = vld [vmem:[%s2783_s11 + $0x208] sm:$0xff]  ;;  %v1475_v7 = vld [vmem:[%s2785_s13 + $0x70] sm:$0xff] }
 0x424   :  { %1269 = vmatpush.msrb.mxu3 %v1259_v50  ;;  %1292 = vmatpush.msrb.mxu1 %v1246_v60  ;;  %v1308_v50 = vld [vmem:[%s2783_s11 + $0xc0] sm:$0xff]  ;;  %v1346_v59 = vld [vmem:[%s2783_s11 + $0x128] sm:$0xff]  ;;  %v1384_v60 = vld [vmem:[%s2783_s11 + $0x190] sm:$0xff] }
 0x425   :  { %1328 = vmatpush.msrb.mxu2 %v1318_v10  ;;  %1402 = vmatpush.msrb.mxu0 %v1392_v25 }
 0x426   :  { %1270 = vmatpush.msrb.mxu3 %v1258_v51  ;;  %v973_v55 = vpop.f32.mrf.mxu3  ;;  %v950_v56 = vpop.f32.mrf.mxu2  ;;  %1293 = vmatpush.msrb.mxu1 %v1245_v61  ;;  %v1386_v51 = vld [vmem:[%s2783_s11 + $0x1a0] sm:$0xff]  ;;  %v1421_v61 = vld [vmem:[%s2783_s11 + $0x1f0] sm:$0xff] }
 0x427   :  { %v898_v52 = vpop.f32.mrf.mxu0  ;;  %v921_v53 = vpop.f32.mrf.mxu1  ;;  %1329 = vmatpush.msrb.mxu2 %v1317_v13  ;;  %1403 = vmatpush.msrb.mxu0 %v1391_v29  ;;  %v1471_v13 = vld [vmem:[%s2785_s13 + $0x50] sm:$0xff] }
 0x428   :  { %1100 = vmatmul.f32.gmra.mxu2 %v898_v52  ;;  %1715 = vmatmul.msk.f32.gmra.mxu3 %vm1003_vm7, %v921_v53 }
 0x429   :  { %1029 = vmatmul.f32.gmra.mxu0 %v898_v52  ;;  %1689 = vmatmul.msk.f32.gmra.mxu1 %vm1003_vm7, %v921_v53  ;;  %v1348_v52 = vld [vmem:[%s2783_s11 + $0x138] sm:$0xff]  ;;  %v1423_v53 = vld [vmem:[%s2783_s11 + $0x200] sm:$0xff] }
 0x42a   :  { %1271 = vmatpush.msrb.mxu3 %v1257_v54  ;;  %1294 = vmatpush.msrb.mxu1 %v1244_v62 }
 0x42b   :  { %1330 = vmatpush.msrb.mxu2 %v1316_v17  ;;  %1404 = vmatpush.msrb.mxu0 %v1390_v33 }
 0x42c   :  { %1272 = vmatpush.msrb.mxu3 %v1256_v63  ;;  %1295 = vmatpush.msrb.mxu1 %v1243_v0  ;;  %v1345_v0 = vld [vmem:[%s2783_s11 + $0x120] sm:$0xff] }
 0x42d   :  { %1331 = vmatpush.msrb.mxu2 %v1315_v20  ;;  %1405 = vmatpush.msrb.mxu0 %v1389_v37 }
 0x42e   :  { %v976_v57 = vpop.f32.mrf.mxu3  ;;  %v953_v58 = vpop.f32.mrf.mxu2  ;;  %1273 = vmatpush.msrb.mxu3 %v1255_v1  ;;  %1296 = vmatpush.msrb.mxu1 %v1242_v3  ;;  %v1383_v1 = vld [vmem:[%s2783_s11 + $0x188] sm:$0xff]  ;;  %v1382_v3 = vld [vmem:[%s2783_s11 + $0x180] sm:$0xff] }
 0x42f   :  { %1332 = vmatpush.msrb.mxu2 %v1314_v24  ;;  %1406 = vmatpush.msrb.mxu0 %v1388_v42  ;;  %v1468_v42 = vld [vmem:[%s2785_s13 + $0x38] sm:$0xff] }
 0x430   :  { %1716 = vmatmul.msk.f32.vlgmr.msra.gmra.mxu3 %vm1003_vm7, %v973_v55  ;;  %1718 = vmatmul.msk.f32.vlgmr.msra.gmra.mxu2 %vm1003_vm7, %v973_v55 }
 0x431   :  { %1151 = vmatmul.f32.vlgmr.msra.gmra.mxu1 %v950_v56  ;;  %1197 = vmatmul.f32.vlgmr.msra.gmra.mxu0 %v950_v56  ;;  %v1347_v56 = vld [vmem:[%s2783_s11 + $0x130] sm:$0xff] }
 0x432   :  { %1274 = vmatpush.msrb.mxu3 %v1254_v2  ;;  %1297 = vmatpush.msrb.mxu1 %v1241_v5  ;;  %v1420_v2 = vld [vmem:[%s2783_s11 + $0x1e8] sm:$0xff] }
 0x433   :  { %1333 = vmatpush.msrb.mxu2 %v1313_v28  ;;  %1407 = vmatpush.msrb.mxu0 %v1387_v48  ;;  %v1462_v48 = vld [vmem:[%s2785_s13 + $0x8] sm:$0xff] }
 0x434   :  { %1275 = vmatpush.msrb.mxu3 %v1253_v4  ;;  %1298 = vmatpush.msrb.mxu1 %v1240_v6  ;;  %v1419_v4 = vld [vmem:[%s2783_s11 + $0x1e0] sm:$0xff] }
 0x435   :  { %1334 = vmatpush.msrb.mxu2 %v1312_v32  ;;  %1408 = vmatpush.msrb.mxu0 %v1386_v51  ;;  %v1514_v51 = vld [vmem:[%s2787_s15 + $0x48] sm:$0xff] }
 0x436   :  { %1276 = vmatpush.msrb.mxu3 %v1252_v8  ;;  %1299 = vmatpush.msrb.mxu1 %v1239_v9  ;;  %v1474_v8 = vld [vmem:[%s2785_s13 + $0x68] sm:$0xff]  ;;  %v1473_v9 = vld [vmem:[%s2785_s13 + $0x60] sm:$0xff] }
 0x437   :  { %1335 = vmatpush.msrb.mxu2 %v1311_v36 }
 0x438   :  { %1717 = vmatmul.msk.f32.gmra.mxu3 %vm1003_vm7, %v976_v57  ;;  %1719 = vmatmul.msk.f32.gmra.mxu2 %vm1003_vm7, %v976_v57  ;;  %v1385_v57 = vld [vmem:[%s2783_s11 + $0x198] sm:$0xff] }
 0x439   :  { %1154 = vmatmul.f32.gmra.mxu1 %v953_v58  ;;  %1200 = vmatmul.f32.gmra.mxu0 %v953_v58  ;;  %v1422_v58 = vld [vmem:[%s2783_s11 + $0x1f8] sm:$0xff]  ;;  %s1803_s11 = smov [#allocation6]  }
 0x43a   :  { %1277 = vmatpush.msrb.mxu3 %v1251_v11  ;;  %1300 = vmatpush.msrb.mxu1 %v1238_v14  ;;  %s1555_s29 = sshll.u32 %s1803_s11, 4  ;;  %s1556_s29 = int_to_ptr.vmem [resolvable:$true] %s1555_s29 }
 0x43b   :  { %1336 = vmatpush.msrb.mxu2 %v1310_v41  ;;  %1409 = vmatpush.msrb.mxu0 %v1385_v57  ;;  %v1469_v41 = vld [vmem:[%s2785_s13 + $0x40] sm:$0xff]  ;;  %v1508_v57 = vld [vmem:[%s2787_s15 + $0x18] sm:$0xff] }
 0x43c   :  { %1278 = vmatpush.msrb.mxu3 %v1250_v12  ;;  %1301 = vmatpush.msrb.mxu1 %v1237_v16  ;;  %v1472_v12 = vld [vmem:[%s2785_s13 + $0x58] sm:$0xff] }
 0x43d   :  { %1337 = vmatpush.msrb.mxu2 %v1309_v47  ;;  %1410 = vmatpush.msrb.mxu0 %v1384_v60  ;;  %v1463_v47 = vld [vmem:[%s2785_s13 + $0x10] sm:$0xff] }
 0x43e   :  { %1279 = vmatpush.msrb.mxu3 %v1249_v15  ;;  %1302 = vmatpush.msrb.mxu1 %v1236_v18 }
 0x43f   :  { %1338 = vmatpush.msrb.mxu2 %v1308_v50  ;;  %1411 = vmatpush.msrb.mxu0 %v1383_v1  ;;  %v1515_v50 = vld [vmem:[%s2787_s15 + $0x50] sm:$0xf] }
 0x440   :  { %1364 = vmatpush.msra.mxu3 %v1356_v19  ;;  %1438 = vmatpush.msra.mxu1 %v1430_v22 }
 0x441   :  { %1412 = vmatpush.msrb.mxu0 %v1382_v3  ;;  %1485 = vmatpush.msra.mxu2 %v1475_v7  ;;  %v1745_v3 = vld [vmem:[%s2784_s12] ss:$0 sm:$0xff] }
 0x442   :  { %1365 = vmatpush.msra.mxu3 %v1355_v23  ;;  %1439 = vmatpush.msra.mxu1 %v1429_v26 }
 0x443   :  { %1486 = vmatpush.msra.mxu2 %v1474_v8  ;;  %v1507_v8 = vld [vmem:[%s2787_s15 + $0x10] sm:$0xff] }
 0x444   :  { %1366 = vmatpush.msra.mxu3 %v1354_v27  ;;  %1440 = vmatpush.msra.mxu1 %v1428_v30 }
 0x445   :  { %1487 = vmatpush.msra.mxu2 %v1473_v9  ;;  %v1506_v9 = vld [vmem:[%s2787_s15 + $0x8] sm:$0xff] }
 0x446   :  { %1367 = vmatpush.msra.mxu3 %v1353_v31  ;;  %1441 = vmatpush.msra.mxu1 %v1427_v38 }
 0x447   :  { %1488 = vmatpush.msra.mxu2 %v1472_v12 }
 0x448   :  { %1368 = vmatpush.msra.mxu3 %v1352_v34  ;;  %1442 = vmatpush.msra.mxu1 %v1426_v39 }
 0x449   :  { %1489 = vmatpush.msra.mxu2 %v1471_v13 }
 0x44a   :  { %1369 = vmatpush.msra.mxu3 %v1351_v35  ;;  %1443 = vmatpush.msra.mxu1 %v1425_v45  ;;  %v1465_v45 = vld [vmem:[%s2785_s13 + $0x20] sm:$0xff] }
 0x44c   :  { %1370 = vmatpush.msra.mxu3 %v1350_v40  ;;  %1444 = vmatpush.msra.mxu1 %v1424_v49  ;;  %v1470_v40 = vld [vmem:[%s2785_s13 + $0x48] sm:$0xff]  ;;  %v1461_v49 = vld [vmem:[%s2785_s13] sm:$0xff] }
 0x44d   :  { %1490 = vmatpush.msra.mxu2 %v1470_v40 }
 0x44e   :  { %1371 = vmatpush.msra.mxu3 %v1349_v46  ;;  %1445 = vmatpush.msra.mxu1 %v1423_v53  ;;  %v1464_v46 = vld [vmem:[%s2785_s13 + $0x18] sm:$0xff] }
 0x44f   :  { %1491 = vmatpush.msra.mxu2 %v1469_v41  ;;  %v1512_v53 = vld [vmem:[%s2787_s15 + $0x38] sm:$0xff] }
 0x450   :  { %1372 = vmatpush.msra.mxu3 %v1348_v52  ;;  %1446 = vmatpush.msra.mxu1 %v1422_v58  ;;  %v1513_v52 = vld [vmem:[%s2787_s15 + $0x40] sm:$0xff] }
 0x451   :  { %1492 = vmatpush.msra.mxu2 %v1468_v42 }
 0x452   :  { %1373 = vmatpush.msra.mxu3 %v1347_v56  ;;  %1447 = vmatpush.msra.mxu1 %v1421_v61  ;;  %v1509_v56 = vld [vmem:[%s2787_s15 + $0x20] sm:$0xff] }
 0x454   :  { %1374 = vmatpush.msra.mxu3 %v1346_v59  ;;  %1448 = vmatpush.msra.mxu1 %v1420_v2 }
 0x456   :  { %1375 = vmatpush.msra.mxu3 %v1345_v0  ;;  %1449 = vmatpush.msra.mxu1 %v1419_v4 }
 0x49e   :  { %v2609_v43 = vpop.f32.mrf.mxu0  ;;  %v2611_v44 = vpop.f32.mrf.mxu1 }
 0x49f   :  { %v1051_v17 = vadd.f32 %v2611_v44, %v2609_v43  ;;  %v1467_v43 = vld [vmem:[%s2785_s13 + $0x30] sm:$0xff]  ;;  %v1466_v44 = vld [vmem:[%s2785_s13 + $0x28] sm:$0xff] }
 0x4a0   :  { %1493 = vmatpush.msra.mxu2 %v1467_v43 }
 0x4a2   :  { %1494 = vmatpush.msra.mxu2 %v1466_v44 }
 0x4a3   :  { %v1098_v54 = vpop.f32.mrf.mxu2  ;;  %v1121_v55 = vpop.f32.mrf.mxu3 }
 0x4a4   :  { %v1122_v14 = vadd.f32 %v1121_v55, %v1098_v54  ;;  %1495 = vmatpush.msra.mxu2 %v1465_v45  ;;  %v1511_v54 = vld [vmem:[%s2787_s15 + $0x30] sm:$0xff]  ;;  %v1510_v55 = vld [vmem:[%s2787_s15 + $0x28] sm:$0xff] }
 0x4a6   :  { %v1030_v62 = vpop.f32.mrf.mxu0  ;;  %v1053_v63 = vpop.f32.mrf.mxu1  ;;  %v1127_v20 = vmax.f32 %v1051_v17, %v1122_v14  ;;  %1496 = vmatpush.msra.mxu2 %v1464_v46 }
 0x4a7   :  { %v1054_v28 = vadd.f32 %v1053_v63, %v1030_v62 }
 0x4a8   :  { %1497 = vmatpush.msra.mxu2 %v1463_v47 }
 0x4aa   :  { %1498 = vmatpush.msra.mxu2 %v1462_v48 }
 0x4ab   :  { %v1101_v5 = vpop.f32.mrf.mxu2  ;;  %v1124_v6 = vpop.f32.mrf.mxu3 }
 0x4ac   :  { %v1125_v25 = vadd.f32 %v1124_v6, %v1101_v5  ;;  %1499 = vmatpush.msra.mxu2 %v1461_v49 }
 0x4ae   :  { %v1152_v10 = vpop.f32.mrf.mxu1  ;;  %v1198_v11 = vpop.f32.mrf.mxu0  ;;  %v1128_v31 = vmax.f32 %v1054_v28, %v1125_v25 }
 0x4b3   :  { %v1175_v15 = vpop.f32.mrf.mxu3  ;;  %v1221_v16 = vpop.f32.mrf.mxu2 }
 0x4b4   :  { %v1176_v18 = vadd.f32 %v1175_v15, %v1152_v10  ;;  %v1222_v19 = vadd.f32 %v1221_v16, %v1198_v11  ;;  %v1505_v10 = vld [vmem:[%s2787_s15] sm:$0xff]  ;;  %s1557_s15 = sshll.u32 %s2789_s17, 4  ;;  %s1558_s15 = int_to_ptr.hbm [resolvable:$true] %s1557_s15 }
 0x4b5   :  { %v1746_v11 = vld [vmem:[%s2786_s14] ss:$0 sm:$0xff] }
 0x4b6   :  { %v1227_v21 = vmax.f32 %v1176_v18, %v1222_v19  ;;  %v1155_v23 = vpop.f32.mrf.mxu1  ;;  %v1201_v24 = vpop.f32.mrf.mxu0  ;;  %v1747_v15 = vld [vmem:[%s2788_s16] ss:$0 sm:$0xff] }
 0x4b8   :  { %v1229_v22 = vmax.f32 %v1127_v20, %v1227_v21 }
 0x4ba   :  { %1232 = vst.msk [vmem:[#allocation2] sm:$0xff] %vm1231_vm8, %v1229_v22 }
 0x4bb   :  { %v1178_v26 = vpop.f32.mrf.mxu3  ;;  %v1224_v27 = vpop.f32.mrf.mxu2 }
 0x4bc   :  { %v1179_v29 = vadd.f32 %v1178_v26, %v1155_v23  ;;  %v1225_v30 = vadd.f32 %v1224_v27, %v1201_v24 }
 0x4be   :  { %v1228_v32 = vmax.f32 %v1179_v29, %v1225_v30 }
 0x4c0   :  { %v1230_v33 = vmax.f32 %v1128_v31, %v1228_v32 }
 0x4c1   :  { %v1248_v34 = vld [vmem:[#allocation2 + $0x2] sm:$0x3]  ;;  %v1307_v35 = vld [vmem:[#allocation2 + $0x4] sm:$0x3]  ;;  %v1235_v36 = vld [vmem:[#allocation2] sm:$0x3] }
 0x4c2   :  { %1720 = vmatmul.msk.f32.vlgmr.msrb.gmra.mxu3 %vm1231_vm8, %v1248_v34  ;;  %1234 = vst.msk [vmem:[#allocation2 + $0x8] sm:$0xf] %vm1233_vm9, %v1230_v33  ;;  %1722 = vmatmul.msk.f32.vlgmr.msrb.gmra.mxu2 %vm1231_vm8, %v1307_v35  ;;  %v1344_v37 = vld [vmem:[#allocation2 + $0x6] sm:$0x3] }
 0x4c3   :  { %1721 = vmatmul.msk.f32.vlgmr.msrb.gmra.mxu1 %vm1231_vm8, %v1235_v36  ;;  %1727 = vmatpush.msk.msrb.mxu3 %vm1524_vm10, %v1515_v50 }
 0x4c5   :  { %1534 = vmatpush.msrb.mxu3 %v1514_v51 }
 0x4c7   :  { %1535 = vmatpush.msrb.mxu3 %v1513_v52 }
 0x4c9   :  { %v1381_v38 = vld [vmem:[#allocation2 + $0x8] sm:$0x3]  ;;  %v1418_v39 = vld [vmem:[#allocation2 + $0xa] sm:$0x3]  ;;  %1536 = vmatpush.msrb.mxu3 %v1512_v53 }
 0x4ca   :  { %1723 = vmatmul.msk.f32.vlgmr.msra.gmra.mxu3 %vm1231_vm8, %v1344_v37  ;;  %1724 = vmatmul.msk.f32.vlgmr.msrb.gmra.mxu0 %vm1231_vm8, %v1381_v38 }
 0x4cb   :  { %1725 = vmatmul.msk.f32.vlgmr.msra.gmra.mxu1 %vm1231_vm8, %v1418_v39  ;;  %1537 = vmatpush.msrb.mxu3 %v1511_v54 }
 0x4cd   :  { %1538 = vmatpush.msrb.mxu3 %v1510_v55 }
 0x4cf   :  { %1539 = vmatpush.msrb.mxu3 %v1509_v56 }
 0x4d1   :  { %1540 = vmatpush.msrb.mxu3 %v1508_v57 }
 0x4d3   :  { %1541 = vmatpush.msrb.mxu3 %v1507_v8 }
 0x4d5   :  { %1542 = vmatpush.msrb.mxu3 %v1506_v9 }
 0x4d7   :  { %1543 = vmatpush.msrb.mxu3 %v1505_v10 }
 0x540   :  { %v1304_v59 = vpop.f32.mrf.mxu1 }
 0x545   :  { %v1281_v58 = vpop.f32.mrf.mxu3  ;;  %v1340_v61 = vpop.f32.mrf.mxu2 }
 0x546   :  { %v1305_v60 = vadd.f32 %v1304_v59, %v1281_v58 }
 0x547   :  { %v1414_v1 = vpop.f32.mrf.mxu0 }
 0x548   :  { %v1343_v62 = vadd.f32 %v1340_v61, %v1305_v60  ;;  %v1451_v4 = vpop.f32.mrf.mxu1 }
 0x54d   :  { %v1377_v63 = vpop.f32.mrf.mxu3 }
 0x54e   :  { %v1380_v0 = vadd.f32 %v1377_v63, %v1343_v62 }
 0x550   :  { %v1417_v2 = vadd.f32 %v1414_v1, %v1380_v0 }
 0x552   :  { %v1454_v5 = vadd.f32 %v1451_v4, %v1417_v2 }
 0x554   :  { %v1459_v6 = vadd.f32 %v1745_v3, %v1454_v5 }
 0x556   :  { %v1460_v7 = vmax.f32 %v1459_v6, 0.0 }
 0x558   :  { %1726 = vmatmul.msk.f32.vlgmr.msra.gmra.mxu2 %vm1480_vm11, %v1460_v7 }
 0x5db   :  { %v1501_v12 = vpop.f32.mrf.mxu2 }
 0x5dc   :  { %v1502_v13 = vadd.f32 %v1746_v11, %v1501_v12 }
 0x5de   :  { %v1504_v14 = vmax.f32 %v1502_v13, 0.0 }
 0x5e0   :  { %1728 = vmatmul.msk.f32.vlgmr.msrb.gmra.mxu3 %vm1520_vm12, %v1504_v14 }
 0x663   :  { %v1545_v16 = vpop.f32.mrf.mxu3 }
 0x664   :  { %v1546_v17 = vadd.f32 %v1747_v15, %v1545_v16 }
 0x666   :  { %1549 = vst.msk [vmem:[#allocation6] sm:$0x3] %vm1548_vm13, %v1546_v17 }
 0x667   :  { %1560 = dma.vmem_to_hbm [thread:$0]  %s1556_s29, 32, %s1558_s15, [#allocation5]  }
 0x668   :  { %1798 = dma.done.wait [#allocation5], 32  }
 0x669   :  { %1799 = vsyncadd [#allocation5], 4294967264 }
 0x66a   :  { %1565 = vsyncpa [#allocation4], 1 }
 0x66b   :  { %1566 = vsyncpa [#allocation5], 1 }

</bundles_post_ra>
